<compile_context>
chip_gen: v5e
topology: v5e:2x2
jax: 0.10.0
libtpu: 0.0.40
codegen_flags: <defaults>
</compile_context>

<pallas_src>
import functools

import jax
import jax.numpy as jnp
from jax.experimental import pallas as pl
from jax.experimental.pallas import tpu as pltpu


def _round_up(x, m):
    return ((x + m - 1) // m) * m


def _leaky_relu(x, slope=0.2):
    return jnp.where(x > 0, x, slope * x)


def discriminator_kernel(x_ref, w1_ref, b1_ref, w2_ref, b2_ref, w3t_ref, b3_ref,
                         out_ref, acc_ref):
    # Grid: (batch_tile i, K-chunk k).  Shapes seen by the kernel:
    #   x:   (TILE_B, TILE_K)      w1: (TILE_K, 512)   b1: (1, 512)
    #   w2:  (512, 256)  b2: (1, 256)   w3t: (1, 256)   b3: (1, 1)
    #   out: (1, TILE_B)           acc: (TILE_B, 512) f32 scratch
    k = pl.program_id(1)
    n_k = pl.num_programs(1)
    wdt = w1_ref.dtype

    x = x_ref[...]
    if x.dtype != wdt:          # cast only on the bf16-weights path
        x = x.astype(wdt)

    # ---- Linear 1, accumulated over K chunks (MXU, f32 accumulation) ----
    part = jnp.dot(x, w1_ref[...], preferred_element_type=jnp.float32)

    @pl.when(k == 0)
    def _():
        acc_ref[...] = part

    @pl.when(k > 0)
    def _():
        acc_ref[...] += part

    # ---- Finalize on the last K chunk: bias+act, layers 2/3, sigmoid ----
    @pl.when(k == n_k - 1)
    def _():
        h1 = _leaky_relu(acc_ref[...] + b1_ref[...].astype(jnp.float32))

        h2 = jnp.dot(h1.astype(wdt), w2_ref[...],
                     preferred_element_type=jnp.float32)
        h2 = _leaky_relu(h2 + b2_ref[...].astype(jnp.float32))

        # 256 -> 1 layer as a single NT dot_general that directly produces the
        # lane-dense (1, TILE_B) output row (no (TILE_B,1)->(1,TILE_B) relayout).
        w3_row = w3t_ref[...].astype(jnp.float32)                    # (1, 256)
        h3 = jax.lax.dot_general(w3_row, h2, (((1,), (1,)), ((), ())),
                                 preferred_element_type=jnp.float32)  # (1, TILE_B)
        h3 = h3 + b3_ref[...].astype(jnp.float32)

        # Sigmoid: exp on EUP, exact reciprocal (keeps 1e-5 agreement w/ ref).
        out_ref[...] = pl.reciprocal(1.0 + jnp.exp(-h3)).astype(out_ref.dtype)


@functools.partial(jax.jit, static_argnames=("tile_b", "weights_dtype"))
def discriminator_forward(img, params, *, tile_b=256, weights_dtype=jnp.bfloat16):
    """img: (B, C, H, W) float32. Returns validity (B, 1) float32.

    weights_dtype=jnp.bfloat16 is the performance default (MXU-rate dtype on
    all generations; f32 accumulation preserved).  Pass jnp.float32 for a
    bit-tight match against the f32 reference.
    """
    B = img.shape[0]
    # Flatten NCHW -> (B, C*H*W), same element order as torch .view.
    x = img.reshape(B, -1).astype(jnp.float32)
    D = x.shape[1]

    w1, b1, w2, b2, w3, b3 = params
    H1 = w1.shape[1]
    H2 = w2.shape[1]
    w3t = w3.reshape(1, H2)  # (256, 1) -> (1, 256) row

    if weights_dtype is not None and jnp.dtype(weights_dtype) != jnp.dtype(jnp.float32):
        w1 = w1.astype(weights_dtype)
        w2 = w2.astype(weights_dtype)
        w3t = w3t.astype(weights_dtype)
    wdt = w1.dtype
    w_item = jnp.dtype(wdt).itemsize

    # ---- Generation-aware VMEM cap (~56 MiB v7x, ~112 MiB v5e/v6e) ----
    try:
        phys_vmem = int(getattr(pltpu.get_tpu_info(), "vmem_capacity_bytes",
                                64 * 1024 * 1024))
    except Exception:
        phys_vmem = 64 * 1024 * 1024
    vmem_cap = (phys_vmem * 7) // 8

    # ---- Batch tiling: fill the MXU, but never pad tiny batches to 256 ----
    assert tile_b % 8 == 0, "tile_b must be a multiple of 8 (sublane size)"
    if B >= 64:
        # aim for >= 2 tiles so v7x's two TensorCores both get work
        eff_tile = min(tile_b, _round_up(-(-B // 2), 8))
    else:
        eff_tile = min(tile_b, _round_up(B, 8))
    n_tiles = -(-B // eff_tile)
    b_pad = n_tiles * eff_tile
    if b_pad != B:
        x = jnp.pad(x, ((0, b_pad - B), (0, 0)))

    # ---- K (=D) tiling of the first matmul so VMEM is bounded for any D ----
    fixed_bytes = ((H1 * H2 + H2) * w_item            # w2, w3t (single buffer)
                   + 2 * (H1 + H2 + 1) * 4            # biases
                   + 2 * eff_tile * 4                 # out rows (double buffer)
                   + eff_tile * H1 * 4                # f32 accumulator scratch
                   + eff_tile * (H1 + H2) * (4 + w_item))   # h1/h2 temporaries
    budget = (vmem_cap * 3) // 4
    per_k_resident = H1 * w_item + eff_tile * (8 + w_item)   # w1(1 buf) + x(2 bufs) + cast
    if fixed_bytes + D * per_k_resident <= budget:
        tile_k, n_k = D, 1
    else:
        per_k_tiled = 2 * H1 * w_item + eff_tile * (8 + w_item)  # w1 double-buffered
        tile_k = max(128, ((budget - fixed_bytes) // per_k_tiled) // 128 * 128)
        n_k = -(-D // tile_k)
        d_pad = n_k * tile_k
        if d_pad != D:
            x = jnp.pad(x, ((0, 0), (0, d_pad - D)))
            w1 = jnp.pad(w1, ((0, d_pad - D), (0, 0)))

    w1_bufs = 1 if n_k == 1 else 2
    est_bytes = (fixed_bytes
                 + w1_bufs * tile_k * H1 * w_item
                 + eff_tile * tile_k * (8 + w_item))
    assert est_bytes <= vmem_cap, (
        f"estimated VMEM footprint {est_bytes} exceeds cap {vmem_cap}; "
        f"reduce tile_b or use bf16 weights")
    vmem_limit = int(min(max(int(est_bytes * 1.25) + (2 << 20), 32 << 20),
                         vmem_cap))

    resident = pl.Buffered(1)  # single-buffer grid-invariant weights/biases

    out = pl.pallas_call(
        discriminator_kernel,
        out_shape=jax.ShapeDtypeStruct((n_tiles, eff_tile), jnp.float32),
        grid=(n_tiles, n_k),
        in_specs=[
            pl.BlockSpec((eff_tile, tile_k), lambda i, k: (i, k)),   # x
            pl.BlockSpec((tile_k, H1), lambda i, k: (k, 0),          # w1
                         pipeline_mode=(resident if n_k == 1 else None)),
            pl.BlockSpec((1, H1), lambda i, k: (0, 0), pipeline_mode=resident),
            pl.BlockSpec((H1, H2), lambda i, k: (0, 0), pipeline_mode=resident),
            pl.BlockSpec((1, H2), lambda i, k: (0, 0), pipeline_mode=resident),
            pl.BlockSpec((1, H2), lambda i, k: (0, 0), pipeline_mode=resident),
            pl.BlockSpec((1, 1), lambda i, k: (0, 0), pipeline_mode=resident),
        ],
        # Lane-dense output: one (1, eff_tile) row per batch tile.
        out_specs=pl.BlockSpec((1, eff_tile), lambda i, k: (i, 0)),
        scratch_shapes=[pltpu.VMEM((eff_tile, H1), jnp.float32)],
        compiler_params=pltpu.CompilerParams(
            dimension_semantics=("parallel", "arbitrary"),
            vmem_limit_bytes=vmem_limit,
        ),
    )(x, w1, b1, w2, b2, w3t, b3)

    return out.reshape(-1)[:B].reshape(B, 1)


def init_params(key, in_dim):
    """Deterministic init mimicking nn.Linear default (U[-1/sqrt(fan_in), +])."""
    dims = [(in_dim, 512), (512, 256), (256, 1)]
    params = []
    for fan_in, fan_out in dims:
        kw, kb, key = jax.random.split(key, 3)
        bound = 1.0 / jnp.sqrt(jnp.float32(fan_in))
        w = jax.random.uniform(kw, (fan_in, fan_out), jnp.float32, -bound, bound)
        b = jax.random.uniform(kb, (1, fan_out), jnp.float32, -bound, bound)
        params.extend([w, b])
    return tuple(params)


def reference_forward(img, params):
    """Pure-JAX reference for correctness check."""
    x = img.reshape(img.shape[0], -1)
    w1, b1, w2, b2, w3, b3 = params
    h = jax.nn.leaky_relu(x @ w1 + b1, 0.2)
    h = jax.nn.leaky_relu(h @ w2 + b2, 0.2)
    return jax.nn.sigmoid(h @ w3 + b3)


if __name__ == "__main__":
    key = jax.random.PRNGKey(0)
    k_img, k_par = jax.random.split(key)

    # Small shapes consistent with the module: B=2, C=4, H=W=16 -> in_dim=1024
    B, C, H, W = 2, 4, 16, 16
    img = jax.random.normal(k_img, (B, C, H, W), jnp.float32)
    params = init_params(k_par, C * H * W)

    ref = reference_forward(img, params)

    # f32 weights: bit-tight check against the pure-JAX reference.
    out_f32 = jax.block_until_ready(
        discriminator_forward(img, params, weights_dtype=jnp.float32))
    assert out_f32.shape == (B, 1), out_f32.shape
    assert jnp.allclose(out_f32, ref, atol=1e-5, rtol=1e-5), (out_f32, ref)

    # bf16 weights (the performance default): looser tolerance.
    out_bf16 = jax.block_until_ready(discriminator_forward(img, params))
    assert out_bf16.shape == (B, 1), out_bf16.shape
    assert jnp.allclose(out_bf16, ref, atol=2e-2, rtol=2e-2), (out_bf16, ref)

    print("KERNEL_OK")
</pallas_src>

<mosaic_0001>
module attributes {stable_mosaic.version = 11 : i64} {
  func.func @discriminator_kernel(%arg0: i32, %arg1: i32, %arg2: memref<8x1024xf32, #tpu.memory_space<vmem>>, %arg3: memref<1024x512xf32, #tpu.memory_space<vmem>>, %arg4: memref<1x512xf32, #tpu.memory_space<vmem>>, %arg5: memref<512x256xf32, #tpu.memory_space<vmem>>, %arg6: memref<1x256xf32, #tpu.memory_space<vmem>>, %arg7: memref<1x256xf32, #tpu.memory_space<vmem>>, %arg8: memref<1x1xf32, #tpu.memory_space<vmem>>, %arg9: memref<1x8xf32, #tpu.memory_space<vmem>>, %arg10: memref<8x512xf32, #tpu.memory_space<vmem>>) attributes {dimension_semantics = [#tpu.dimension_semantics<parallel>, #tpu.dimension_semantics<arbitrary>], iteration_bounds = array<i64: 1, 1>, scalar_prefetch = 0 : i64, scratch_operands = 1 : i64, tpu.core_type = #tpu.core_type<tc>, window_params = [{transform_indices = @transform_0, window_bounds = array<i64: 8, 1024>}, {pipeline_mode = #tpu.pipeline_mode<synchronous>, transform_indices = @transform_1, window_bounds = array<i64: 1024, 512>}, {pipeline_mode = #tpu.pipeline_mode<synchronous>, transform_indices = @transform_2, window_bounds = array<i64: 1, 512>}, {pipeline_mode = #tpu.pipeline_mode<synchronous>, transform_indices = @transform_3, window_bounds = array<i64: 512, 256>}, {pipeline_mode = #tpu.pipeline_mode<synchronous>, transform_indices = @transform_4, window_bounds = array<i64: 1, 256>}, {pipeline_mode = #tpu.pipeline_mode<synchronous>, transform_indices = @transform_5, window_bounds = array<i64: 1, 256>}, {pipeline_mode = #tpu.pipeline_mode<synchronous>, transform_indices = @transform_6, window_bounds = array<i64: 1, 1>}, {transform_indices = @transform_7, window_bounds = array<i64: 1, 8>}]} {
    %c0 = arith.constant 0 : index
    %c0_0 = arith.constant 0 : index
    %0 = vector.load %arg2[%c0, %c0_0] : memref<8x1024xf32, #tpu.memory_space<vmem>>, vector<8x1024xf32>
    %c0_1 = arith.constant 0 : index
    %c0_2 = arith.constant 0 : index
    %1 = vector.load %arg3[%c0_1, %c0_2] : memref<1024x512xf32, #tpu.memory_space<vmem>>, vector<1024x512xf32>
    %cst = arith.constant dense<0.000000e+00> : vector<8x512xf32>
    %2 = tpu.matmul %0, %1, %cst {dimension_numbers = #tpu.dot_dimension_numbers<[1], [0], [0], [1], [0, 0, 1, 1], [], []>} : vector<8x1024xf32>, vector<1024x512xf32>, vector<8x512xf32> -> vector<8x512xf32>
    %c0_i32 = arith.constant 0 : i32
    %3 = arith.cmpi eq, %arg1, %c0_i32 : i32
    %4 = arith.extui %3 : i1 to i32
    %c0_i32_3 = arith.constant 0 : i32
    %5 = arith.cmpi ne, %4, %c0_i32_3 : i32
    scf.if %5 {
      %c0_8 = arith.constant 0 : index
      %c0_9 = arith.constant 0 : index
      %12 = vector.load %arg10[%c0_8, %c0_9] : memref<8x512xf32, #tpu.memory_space<vmem>>, vector<8x512xf32>
      tpu.vector_store %arg10[%c0_8, %c0_9], %2 {strides = array<i32>} : memref<8x512xf32, #tpu.memory_space<vmem>>, vector<8x512xf32>,
    } else {
    }
    %c0_i32_4 = arith.constant 0 : i32
    %6 = arith.cmpi sgt, %arg1, %c0_i32_4 : i32
    %7 = arith.extui %6 : i1 to i32
    %c0_i32_5 = arith.constant 0 : i32
    %8 = arith.cmpi ne, %7, %c0_i32_5 : i32
    scf.if %8 {
      %c0_8 = arith.constant 0 : index
      %c0_9 = arith.constant 0 : index
      %12 = vector.load %arg10[%c0_8, %c0_9] : memref<8x512xf32, #tpu.memory_space<vmem>>, vector<8x512xf32>
      %13 = arith.addf %12, %2 : vector<8x512xf32>
      %c0_10 = arith.constant 0 : index
      %c0_11 = arith.constant 0 : index
      %14 = vector.load %arg10[%c0_10, %c0_11] : memref<8x512xf32, #tpu.memory_space<vmem>>, vector<8x512xf32>
      tpu.vector_store %arg10[%c0_10, %c0_11], %13 {strides = array<i32>} : memref<8x512xf32, #tpu.memory_space<vmem>>, vector<8x512xf32>,
    } else {
    }
    %c0_i32_6 = arith.constant 0 : i32
    %9 = arith.cmpi eq, %arg1, %c0_i32_6 : i32
    %10 = arith.extui %9 : i1 to i32
    %c0_i32_7 = arith.constant 0 : i32
    %11 = arith.cmpi ne, %10, %c0_i32_7 : i32
    scf.if %11 {
      %c0_8 = arith.constant 0 : index
      %c0_9 = arith.constant 0 : index
      %12 = vector.load %arg10[%c0_8, %c0_9] : memref<8x512xf32, #tpu.memory_space<vmem>>, vector<8x512xf32>
      %c0_10 = arith.constant 0 : index
      %c0_11 = arith.constant 0 : index
      %13 = vector.load %arg4[%c0_10, %c0_11] : memref<1x512xf32, #tpu.memory_space<vmem>>, vector<1x512xf32>
      %14 = vector.broadcast %13 : vector<1x512xf32> to vector<8x512xf32>
      %15 = arith.addf %12, %14 : vector<8x512xf32>
      %cst_12 = arith.constant 0.000000e+00 : f32
      %16 = vector.broadcast %cst_12 : f32 to vector<8x512xf32>
      %17 = arith.cmpf ogt, %15, %16 : vector<8x512xf32>
      %cst_13 = arith.constant 2.000000e-01 : f32
      %18 = vector.broadcast %cst_13 : f32 to vector<8x512xf32>
      %19 = arith.mulf %18, %15 : vector<8x512xf32>
      %20 = arith.select %17, %15, %19 : vector<8x512xi1>, vector<8x512xf32>
      %c0_14 = arith.constant 0 : index
      %c0_15 = arith.constant 0 : index
      %21 = vector.load %arg5[%c0_14, %c0_15] : memref<512x256xf32, #tpu.memory_space<vmem>>, vector<512x256xf32>
      %cst_16 = arith.constant dense<0.000000e+00> : vector<8x256xf32>
      %22 = tpu.matmul %20, %21, %cst_16 {dimension_numbers = #tpu.dot_dimension_numbers<[1], [0], [0], [1], [0, 0, 1, 1], [], []>} : vector<8x512xf32>, vector<512x256xf32>, vector<8x256xf32> -> vector<8x256xf32>
      %c0_17 = arith.constant 0 : index
      %c0_18 = arith.constant 0 : index
      %23 = vector.load %arg6[%c0_17, %c0_18] : memref<1x256xf32, #tpu.memory_space<vmem>>, vector<1x256xf32>
      %24 = vector.broadcast %23 : vector<1x256xf32> to vector<8x256xf32>
      %25 = arith.addf %22, %24 : vector<8x256xf32>
      %cst_19 = arith.constant 0.000000e+00 : f32
      %26 = vector.broadcast %cst_19 : f32 to vector<8x256xf32>
      %27 = arith.cmpf ogt, %25, %26 : vector<8x256xf32>
      %cst_20 = arith.constant 2.000000e-01 : f32
      %28 = vector.broadcast %cst_20 : f32 to vector<8x256xf32>
      %29 = arith.mulf %28, %25 : vector<8x256xf32>
      %30 = arith.select %27, %25, %29 : vector<8x256xi1>, vector<8x256xf32>
      %c0_21 = arith.constant 0 : index
      %c0_22 = arith.constant 0 : index
      %31 = vector.load %arg7[%c0_21, %c0_22] : memref<1x256xf32, #tpu.memory_space<vmem>>, vector<1x256xf32>
      %cst_23 = arith.constant dense<0.000000e+00> : vector<1x8xf32>
      %32 = tpu.matmul %31, %30, %cst_23 {dimension_numbers = #tpu.dot_dimension_numbers<[1], [1], [0], [0], [0, 0, 1, 0], [], []>} : vector<1x256xf32>, vector<8x256xf32>, vector<1x8xf32> -> vector<1x8xf32>
      %c0_24 = arith.constant 0 : index
      %c0_25 = arith.constant 0 : index
      %33 = vector.load %arg8[%c0_24, %c0_25] : memref<1x1xf32, #tpu.memory_space<vmem>>, vector<1x1xf32>
      %34 = vector.broadcast %33 : vector<1x1xf32> to vector<1x8xf32>
      %35 = arith.addf %32, %34 : vector<1x8xf32>
      %cst_26 = arith.constant 0.000000e+00 : f32
      %36 = vector.broadcast %cst_26 : f32 to vector<1x8xf32>
      %37 = arith.subf %36, %35 : vector<1x8xf32>
      %38 = math.exp %37 : vector<1x8xf32>
      %cst_27 = arith.constant 1.000000e+00 : f32
      %39 = vector.broadcast %cst_27 : f32 to vector<1x8xf32>
      %40 = arith.addf %39, %38 : vector<1x8xf32>
      %41 = tpu.reciprocal %40 : vector<1x8xf32> -> vector<1x8xf32>
      %c0_28 = arith.constant 0 : index
      %c0_29 = arith.constant 0 : index
      %42 = vector.load %arg9[%c0_28, %c0_29] : memref<1x8xf32, #tpu.memory_space<vmem>>, vector<1x8xf32>
      tpu.vector_store %arg9[%c0_28, %c0_29], %41 {strides = array<i32>} : memref<1x8xf32, #tpu.memory_space<vmem>>, vector<1x8xf32>,
    } else {
    }
    return
  }
  func.func @transform_0(%arg0: i32, %arg1: i32) -> (i32, i32) {
    %c0_i32 = arith.constant 0 : i32
    return %arg0, %arg1 : i32, i32
  }
  func.func @transform_1(%arg0: i32, %arg1: i32) -> (i32, i32) {
    %c0_i32 = arith.constant 0 : i32
    %c0_i32_0 = arith.constant 0 : i32
    return %arg1, %c0_i32 : i32, i32
  }
  func.func @transform_2(%arg0: i32, %arg1: i32) -> (i32, i32) {
    %c0_i32 = arith.constant 0 : i32
    %c0_i32_0 = arith.constant 0 : i32
    %c0_i32_1 = arith.constant 0 : i32
    return %c0_i32, %c0_i32_0 : i32, i32
  }
  func.func @transform_3(%arg0: i32, %arg1: i32) -> (i32, i32) {
    %c0_i32 = arith.constant 0 : i32
    %c0_i32_0 = arith.constant 0 : i32
    %c0_i32_1 = arith.constant 0 : i32
    return %c0_i32, %c0_i32_0 : i32, i32
  }
  func.func @transform_4(%arg0: i32, %arg1: i32) -> (i32, i32) {
    %c0_i32 = arith.constant 0 : i32
    %c0_i32_0 = arith.constant 0 : i32
    %c0_i32_1 = arith.constant 0 : i32
    return %c0_i32, %c0_i32_0 : i32, i32
  }
  func.func @transform_5(%arg0: i32, %arg1: i32) -> (i32, i32) {
    %c0_i32 = arith.constant 0 : i32
    %c0_i32_0 = arith.constant 0 : i32
    %c0_i32_1 = arith.constant 0 : i32
    return %c0_i32, %c0_i32_0 : i32, i32
  }
  func.func @transform_6(%arg0: i32, %arg1: i32) -> (i32, i32) {
    %c0_i32 = arith.constant 0 : i32
    %c0_i32_0 = arith.constant 0 : i32
    %c0_i32_1 = arith.constant 0 : i32
    return %c0_i32, %c0_i32_0 : i32, i32
  }
  func.func @transform_7(%arg0: i32, %arg1: i32) -> (i32, i32) {
    %c0_i32 = arith.constant 0 : i32
    %c0_i32_0 = arith.constant 0 : i32
    return %arg0, %c0_i32 : i32, i32
  }
}

</mosaic_0001>

<bundles_post_ra>
// kernel: discriminator_forward.1
= control target key start
LH: loop header
LB: loop body
LE: loop exit
PB: predicated region body
PF: predicated region fallthrough
CT: control target
= control target key end

     0   :  { %s2067_s0 = inlined_call_operand.vmem [shape: f32[8,1024], index: 0, kind: input, shape index: {}]   ;;  %s2068_s1 = inlined_call_operand.hbm [shape: f32[1024,512], index: 1, kind: input, shape index: {}]   ;;  %s2069_s2 = inlined_call_operand.hbm [shape: f32[1,512], index: 2, kind: input, shape index: {}]   ;;  %s2070_s3 = inlined_call_operand.hbm [shape: f32[512,256], index: 3, kind: input, shape index: {}]   ;;  %s2071_s4 = inlined_call_operand.hbm [shape: f32[1,256], index: 4, kind: input, shape index: {}]   ;;  %s2072_s5 = inlined_call_operand.hbm [shape: f32[1,256], index: 5, kind: input, shape index: {}]   ;;  %s2073_s6 = inlined_call_operand.<no memory space> [shape: f32[1,1], index: 6, kind: input, shape index: {}]   ;;  %s2074_s7 = inlined_call_operand.vmem [shape: f32[1,8], index: 7, kind: output, shape index: {}]  }
   0x1   :  { %v12_v0 = vstv %s2073_s6 }
   0x2   :  { %13 = vst [vmem:[#allocation3] sm:$0x1] %v12_v0 }
   0x3   :  { %14 = vsyncpa [#allocation5], 0 }
   0x4   :  { %15 = vsyncpa [#allocation7], 0  ;;  %s37_s28 = sshll.u32 %s2069_s2, 4  ;;  %s38_s28 = int_to_ptr.hbm [resolvable:$true] %s37_s28 }
   0x5   :  { %16 = vsyncpa [#allocation10], 0  ;;  %s1846_s29 = smov [#allocation6]   ;;  %s61_s10 = sshll.u32 %s2071_s4, 4  ;;  %s62_s10 = int_to_ptr.hbm [resolvable:$true] %s61_s10 }
   0x6   :  { %s39_s30 = sshll.u32 %s1846_s29, 4  ;;  %s1847_s11 = smov [#allocation9]   ;;  %s40_s30 = int_to_ptr.vmem [resolvable:$true] %s39_s30 }
   0x7   :  { %42 = dma.hbm_to_vmem [thread:$0]  %s38_s28, 64, %s40_s30, [#allocation7]  }
   0x8   :  { %s63_s6 = sshll.u32 %s1847_s11, 4  ;;  %s23_s14 = sshll.u32 %s2068_s1, 4  ;;  %s64_s6 = int_to_ptr.vmem [resolvable:$true] %s63_s6  ;;  %s24_s14 = int_to_ptr.hbm [resolvable:$true] %s23_s14 }
   0x9   :  { %66 = dma.hbm_to_vmem [thread:$0]  %s62_s10, 32, %s64_s6, [#allocation10]  }
   0xa   :  { %s1848_s2 = smov [#allocation4]   ;;  %s47_s18 = sshll.u32 %s2070_s3, 4  ;;  %s48_s18 = int_to_ptr.hbm [resolvable:$true] %s47_s18 }
   0xb   :  { %s25_s15 = sshll.u32 %s1848_s2, 4  ;;  %s1849_s19 = smov 512   ;;  %s26_s15 = int_to_ptr.vmem [resolvable:$true] %s25_s15 }
   0xc   :  { %s1850_s4 = smov 32   ;;  %s1851_s20 = smov [#allocation8]  }
   0xd   :  { %31 = dma.hbm_to_vmem [thread:$0]  %s24_s14, 65536, %s26_s15, [#allocation5], %s1849_s19, %s1849_s19, %s1850_s4  }
   0xe   :  { %s49_s21 = sshll.u32 %s1851_s20, 4  ;;  %s1852_s22 = smov 256   ;;  %s50_s21 = int_to_ptr.vmem [resolvable:$true] %s49_s21 }
   0xf   :  { %s1853_s23 = smov 16   ;;  %s72_s25 = sshll.u32 %s2072_s5, 4  ;;  %s73_s25 = int_to_ptr.hbm [resolvable:$true] %s72_s25 }
  0x10   :  { %55 = dma.hbm_to_vmem [thread:$0]  %s48_s18, 16384, %s50_s21, [#allocation7], %s1852_s22, %s1852_s22, %s1853_s23  }
  0x11   :  { %s1854_s26 = smov [#allocation11]  }
  0x12   :  { %s74_s27 = sshll.u32 %s1854_s26, 4  ;;  %s75_s27 = int_to_ptr.vmem [resolvable:$true] %s74_s27 }
  0x13   :  { %77 = dma.hbm_to_vmem [thread:$0]  %s73_s25, 32, %s75_s27, [#allocation10]  }
  0x14   :  { %1840 = dma.done.wait [#allocation5], 65536  }
  0x15   :  { %1841 = vsyncadd [#allocation5], 4294901760 }
  0x16   :  { %1842 = dma.done.wait [#allocation7], 16448  }
  0x17   :  { %1843 = vsyncadd [#allocation7], 4294950848 }
  0x18   :  { %1844 = dma.done.wait [#allocation10], 64  }
  0x19   :  { %1845 = vsyncadd [#allocation10], 4294967232  ;;  %v168_v1 = vld [vmem:[#allocation4 + $0x1e0] sm:$0xff]  ;;  %vm1688_vm9 = vcmask 57344  }
  0x1a   :  { %v232_v2 = vld [vmem:[#allocation4 + $0x3e0] sm:$0xff]  ;;  %620 = vmatpush.msra.mxu0 %v168_v1 }
  0x1b   :  { %v296_v3 = vld [vmem:[#allocation4 + $0x5e0] sm:$0xff]  ;;  %640 = vmatpush.msra.mxu1 %v232_v2 }
  0x1c   :  { %v164_v4 = vld [vmem:[#allocation4 + $0x1c0] sm:$0xff]  ;;  %660 = vmatpush.msra.mxu2 %v296_v3 }
  0x1d   :  { %v228_v5 = vld [vmem:[#allocation4 + $0x3c0] sm:$0xff]  ;;  %621 = vmatpush.msra.mxu0 %v164_v4 }
  0x1e   :  { %v292_v6 = vld [vmem:[#allocation4 + $0x5c0] sm:$0xff]  ;;  %641 = vmatpush.msra.mxu1 %v228_v5 }
  0x1f   :  { %v360_v7 = vld [vmem:[#allocation4 + $0x7e0] sm:$0xff]  ;;  %661 = vmatpush.msra.mxu2 %v292_v6 }
  0x20   :  { %v160_v8 = vld [vmem:[#allocation4 + $0x1a0] sm:$0xff]  ;;  %680 = vmatpush.msra.mxu3 %v360_v7 }
  0x21   :  { %v224_v9 = vld [vmem:[#allocation4 + $0x3a0] sm:$0xff]  ;;  %622 = vmatpush.msra.mxu0 %v160_v8 }
  0x22   :  { %v288_v10 = vld [vmem:[#allocation4 + $0x5a0] sm:$0xff]  ;;  %642 = vmatpush.msra.mxu1 %v224_v9 }
  0x23   :  { %v356_v11 = vld [vmem:[#allocation4 + $0x7c0] sm:$0xff]  ;;  %662 = vmatpush.msra.mxu2 %v288_v10 }
  0x24   :  { %v156_v12 = vld [vmem:[#allocation4 + $0x180] sm:$0xff]  ;;  %681 = vmatpush.msra.mxu3 %v356_v11 }
  0x25   :  { %v220_v13 = vld [vmem:[#allocation4 + $0x380] sm:$0xff]  ;;  %623 = vmatpush.msra.mxu0 %v156_v12 }
  0x26   :  { %v284_v14 = vld [vmem:[#allocation4 + $0x580] sm:$0xff]  ;;  %643 = vmatpush.msra.mxu1 %v220_v13 }
  0x27   :  { %v352_v15 = vld [vmem:[#allocation4 + $0x7a0] sm:$0xff]  ;;  %663 = vmatpush.msra.mxu2 %v284_v14 }
  0x28   :  { %v152_v16 = vld [vmem:[#allocation4 + $0x160] sm:$0xff]  ;;  %682 = vmatpush.msra.mxu3 %v352_v15 }
  0x29   :  { %v216_v17 = vld [vmem:[#allocation4 + $0x360] sm:$0xff]  ;;  %624 = vmatpush.msra.mxu0 %v152_v16 }
  0x2a   :  { %v280_v18 = vld [vmem:[#allocation4 + $0x560] sm:$0xff]  ;;  %644 = vmatpush.msra.mxu1 %v216_v17 }
  0x2b   :  { %v348_v19 = vld [vmem:[#allocation4 + $0x780] sm:$0xff]  ;;  %664 = vmatpush.msra.mxu2 %v280_v18 }
  0x2c   :  { %v148_v20 = vld [vmem:[#allocation4 + $0x140] sm:$0xff]  ;;  %683 = vmatpush.msra.mxu3 %v348_v19 }
  0x2d   :  { %v212_v21 = vld [vmem:[#allocation4 + $0x340] sm:$0xff]  ;;  %625 = vmatpush.msra.mxu0 %v148_v20 }
  0x2e   :  { %v276_v22 = vld [vmem:[#allocation4 + $0x540] sm:$0xff]  ;;  %645 = vmatpush.msra.mxu1 %v212_v21 }
  0x2f   :  { %v344_v23 = vld [vmem:[#allocation4 + $0x760] sm:$0xff]  ;;  %665 = vmatpush.msra.mxu2 %v276_v22 }
  0x30   :  { %v144_v24 = vld [vmem:[#allocation4 + $0x120] sm:$0xff]  ;;  %684 = vmatpush.msra.mxu3 %v344_v23 }
  0x31   :  { %v208_v25 = vld [vmem:[#allocation4 + $0x320] sm:$0xff]  ;;  %626 = vmatpush.msra.mxu0 %v144_v24 }
  0x32   :  { %v272_v26 = vld [vmem:[#allocation4 + $0x520] sm:$0xff]  ;;  %646 = vmatpush.msra.mxu1 %v208_v25 }
  0x33   :  { %v340_v27 = vld [vmem:[#allocation4 + $0x740] sm:$0xff]  ;;  %666 = vmatpush.msra.mxu2 %v272_v26 }
  0x34   :  { %v140_v28 = vld [vmem:[#allocation4 + $0x100] sm:$0xff]  ;;  %685 = vmatpush.msra.mxu3 %v340_v27 }
  0x35   :  { %v204_v29 = vld [vmem:[#allocation4 + $0x300] sm:$0xff]  ;;  %627 = vmatpush.msra.mxu0 %v140_v28 }
  0x36   :  { %v268_v30 = vld [vmem:[#allocation4 + $0x500] sm:$0xff]  ;;  %647 = vmatpush.msra.mxu1 %v204_v29 }
  0x37   :  { %v336_v31 = vld [vmem:[#allocation4 + $0x720] sm:$0xff]  ;;  %667 = vmatpush.msra.mxu2 %v268_v30 }
  0x38   :  { %v136_v32 = vld [vmem:[#allocation4 + $0xe0] sm:$0xff]  ;;  %686 = vmatpush.msra.mxu3 %v336_v31 }
  0x39   :  { %v200_v33 = vld [vmem:[#allocation4 + $0x2e0] sm:$0xff]  ;;  %628 = vmatpush.msra.mxu0 %v136_v32 }
  0x3a   :  { %v264_v34 = vld [vmem:[#allocation4 + $0x4e0] sm:$0xff]  ;;  %648 = vmatpush.msra.mxu1 %v200_v33 }
  0x3b   :  { %v332_v35 = vld [vmem:[#allocation4 + $0x700] sm:$0xff]  ;;  %668 = vmatpush.msra.mxu2 %v264_v34 }
  0x3c   :  { %v132_v36 = vld [vmem:[#allocation4 + $0xc0] sm:$0xff]  ;;  %687 = vmatpush.msra.mxu3 %v332_v35 }
  0x3d   :  { %v196_v37 = vld [vmem:[#allocation4 + $0x2c0] sm:$0xff]  ;;  %629 = vmatpush.msra.mxu0 %v132_v36 }
  0x3e   :  { %v260_v38 = vld [vmem:[#allocation4 + $0x4c0] sm:$0xff]  ;;  %649 = vmatpush.msra.mxu1 %v196_v37 }
  0x3f   :  { %v328_v39 = vld [vmem:[#allocation4 + $0x6e0] sm:$0xff]  ;;  %669 = vmatpush.msra.mxu2 %v260_v38 }
  0x40   :  { %v128_v40 = vld [vmem:[#allocation4 + $0xa0] sm:$0xff]  ;;  %688 = vmatpush.msra.mxu3 %v328_v39 }
  0x41   :  { %v192_v41 = vld [vmem:[#allocation4 + $0x2a0] sm:$0xff]  ;;  %630 = vmatpush.msra.mxu0 %v128_v40 }
  0x42   :  { %v256_v42 = vld [vmem:[#allocation4 + $0x4a0] sm:$0xff]  ;;  %650 = vmatpush.msra.mxu1 %v192_v41 }
  0x43   :  { %v324_v43 = vld [vmem:[#allocation4 + $0x6c0] sm:$0xff]  ;;  %670 = vmatpush.msra.mxu2 %v256_v42 }
  0x44   :  { %v124_v44 = vld [vmem:[#allocation4 + $0x80] sm:$0xff]  ;;  %689 = vmatpush.msra.mxu3 %v324_v43 }
  0x45   :  { %v188_v45 = vld [vmem:[#allocation4 + $0x280] sm:$0xff]  ;;  %631 = vmatpush.msra.mxu0 %v124_v44 }
  0x46   :  { %v252_v46 = vld [vmem:[#allocation4 + $0x480] sm:$0xff]  ;;  %651 = vmatpush.msra.mxu1 %v188_v45 }
  0x47   :  { %v320_v47 = vld [vmem:[#allocation4 + $0x6a0] sm:$0xff]  ;;  %671 = vmatpush.msra.mxu2 %v252_v46 }
  0x48   :  { %v120_v48 = vld [vmem:[#allocation4 + $0x60] sm:$0xff]  ;;  %690 = vmatpush.msra.mxu3 %v320_v47 }
  0x49   :  { %v184_v49 = vld [vmem:[#allocation4 + $0x260] sm:$0xff]  ;;  %632 = vmatpush.msra.mxu0 %v120_v48 }
  0x4a   :  { %v248_v50 = vld [vmem:[#allocation4 + $0x460] sm:$0xff]  ;;  %652 = vmatpush.msra.mxu1 %v184_v49 }
  0x4b   :  { %v316_v51 = vld [vmem:[#allocation4 + $0x680] sm:$0xff]  ;;  %672 = vmatpush.msra.mxu2 %v248_v50 }
  0x4c   :  { %v116_v52 = vld [vmem:[#allocation4 + $0x40] sm:$0xff]  ;;  %691 = vmatpush.msra.mxu3 %v316_v51 }
  0x4d   :  { %v180_v53 = vld [vmem:[#allocation4 + $0x240] sm:$0xff]  ;;  %633 = vmatpush.msra.mxu0 %v116_v52 }
  0x4e   :  { %v244_v54 = vld [vmem:[#allocation4 + $0x440] sm:$0xff]  ;;  %653 = vmatpush.msra.mxu1 %v180_v53 }
  0x4f   :  { %v312_v55 = vld [vmem:[#allocation4 + $0x660] sm:$0xff]  ;;  %673 = vmatpush.msra.mxu2 %v244_v54 }
  0x50   :  { %v112_v56 = vld [vmem:[#allocation4 + $0x20] sm:$0xff]  ;;  %692 = vmatpush.msra.mxu3 %v312_v55 }
  0x51   :  { %v176_v57 = vld [vmem:[#allocation4 + $0x220] sm:$0xff]  ;;  %634 = vmatpush.msra.mxu0 %v112_v56  ;;  %v1917_v56 = vld [vmem:[%s2067_s0 + $0x10] sm:$0xff] }
  0x52   :  { %v240_v58 = vld [vmem:[#allocation4 + $0x420] sm:$0xff]  ;;  %654 = vmatpush.msra.mxu1 %v176_v57 }
  0x53   :  { %v308_v59 = vld [vmem:[#allocation4 + $0x640] sm:$0xff]  ;;  %674 = vmatpush.msra.mxu2 %v240_v58 }
  0x54   :  { %v108_v60 = vld [vmem:[#allocation4] sm:$0xff]  ;;  %693 = vmatpush.msra.mxu3 %v308_v59 }
  0x55   :  { %v172_v61 = vld [vmem:[#allocation4 + $0x200] sm:$0xff]  ;;  %635 = vmatpush.msra.mxu0 %v108_v60 }
  0x56   :  { %v236_v62 = vld [vmem:[#allocation4 + $0x400] sm:$0xff]  ;;  %655 = vmatpush.msra.mxu1 %v172_v61 }
  0x57   :  { %v304_v63 = vld [vmem:[#allocation4 + $0x620] sm:$0xff]  ;;  %675 = vmatpush.msra.mxu2 %v236_v62  ;;  %v1928_v62 = vld [vmem:[%s2067_s0 + $0x18] sm:$0xff] }
  0x58   :  { %v424_v0 = vld [vmem:[#allocation4 + $0x9e0] sm:$0xff]  ;;  %694 = vmatpush.msra.mxu3 %v304_v63  ;;  %676 = vmatmul.f32.vlgmr.msra.gmra.mxu2 %v1917_v56 }
  0x59   :  { %v488_v1 = vld [vmem:[#allocation4 + $0xbe0] sm:$0xff]  ;;  %700 = vmatpush.msrb.mxu0 %v424_v0 }
  0x5a   :  { %v552_v2 = vld [vmem:[#allocation4 + $0xde0] sm:$0xff]  ;;  %720 = vmatpush.msrb.mxu1 %v488_v1 }
  0x5b   :  { %v300_v3 = vld [vmem:[#allocation4 + $0x600] sm:$0xff]  ;;  %740 = vmatpush.msrb.mxu2 %v552_v2 }
  0x5c   :  { %v420_v4 = vld [vmem:[#allocation4 + $0x9c0] sm:$0xff]  ;;  %695 = vmatpush.msra.mxu3 %v300_v3 }
  0x5d   :  { %v484_v5 = vld [vmem:[#allocation4 + $0xbc0] sm:$0xff]  ;;  %701 = vmatpush.msrb.mxu0 %v420_v4  ;;  %696 = vmatmul.f32.vlgmr.msra.gmra.mxu3 %v1928_v62  ;;  %v169_v4 = vld [vmem:[#allocation4 + $0x1e8] sm:$0xff] }
  0x5e   :  { %v548_v6 = vld [vmem:[#allocation4 + $0xdc0] sm:$0xff]  ;;  %721 = vmatpush.msrb.mxu1 %v484_v5  ;;  %v233_v5 = vld [vmem:[#allocation4 + $0x3e8] sm:$0xff] }
  0x5f   :  { %v616_v7 = vld [vmem:[#allocation4 + $0xfe0] sm:$0xff]  ;;  %741 = vmatpush.msrb.mxu2 %v548_v6  ;;  %v297_v6 = vld [vmem:[#allocation4 + $0x5e8] sm:$0xff] }
  0x60   :  { %v416_v8 = vld [vmem:[#allocation4 + $0x9a0] sm:$0xff]  ;;  %760 = vmatpush.msrb.mxu3 %v616_v7 }
  0x61   :  { %v480_v9 = vld [vmem:[#allocation4 + $0xba0] sm:$0xff]  ;;  %702 = vmatpush.msrb.mxu0 %v416_v8  ;;  %v165_v8 = vld [vmem:[#allocation4 + $0x1c8] sm:$0xff] }
  0x62   :  { %v544_v10 = vld [vmem:[#allocation4 + $0xda0] sm:$0xff]  ;;  %722 = vmatpush.msrb.mxu1 %v480_v9  ;;  %v229_v9 = vld [vmem:[#allocation4 + $0x3c8] sm:$0xff] }
  0x63   :  { %v612_v11 = vld [vmem:[#allocation4 + $0xfc0] sm:$0xff]  ;;  %742 = vmatpush.msrb.mxu2 %v544_v10  ;;  %v293_v10 = vld [vmem:[#allocation4 + $0x5c8] sm:$0xff] }
  0x64   :  { %v412_v12 = vld [vmem:[#allocation4 + $0x980] sm:$0xff]  ;;  %761 = vmatpush.msrb.mxu3 %v612_v11  ;;  %v361_v11 = vld [vmem:[#allocation4 + $0x7e8] sm:$0xff] }
  0x65   :  { %v476_v13 = vld [vmem:[#allocation4 + $0xb80] sm:$0xff]  ;;  %703 = vmatpush.msrb.mxu0 %v412_v12  ;;  %v1941_v12 = vld [vmem:[%s2067_s0 + $0x30] sm:$0xff] }
  0x66   :  { %v540_v14 = vld [vmem:[#allocation4 + $0xd80] sm:$0xff]  ;;  %723 = vmatpush.msrb.mxu1 %v476_v13  ;;  %v161_v13 = vld [vmem:[#allocation4 + $0x1a8] sm:$0xff] }
  0x67   :  { %v608_v15 = vld [vmem:[#allocation4 + $0xfa0] sm:$0xff]  ;;  %743 = vmatpush.msrb.mxu2 %v540_v14  ;;  %v225_v14 = vld [vmem:[#allocation4 + $0x3a8] sm:$0xff] }
  0x68   :  { %v408_v16 = vld [vmem:[#allocation4 + $0x960] sm:$0xff]  ;;  %762 = vmatpush.msrb.mxu3 %v608_v15  ;;  %v289_v15 = vld [vmem:[#allocation4 + $0x5a8] sm:$0xff] }
  0x69   :  { %v472_v17 = vld [vmem:[#allocation4 + $0xb60] sm:$0xff]  ;;  %704 = vmatpush.msrb.mxu0 %v408_v16  ;;  %v357_v16 = vld [vmem:[#allocation4 + $0x7c8] sm:$0xff] }
  0x6a   :  { %v536_v18 = vld [vmem:[#allocation4 + $0xd60] sm:$0xff]  ;;  %724 = vmatpush.msrb.mxu1 %v472_v17 }
  0x6b   :  { %v604_v19 = vld [vmem:[#allocation4 + $0xf80] sm:$0xff]  ;;  %744 = vmatpush.msrb.mxu2 %v536_v18  ;;  %v1952_v18 = vld [vmem:[%s2067_s0 + $0x38] sm:$0xff] }
  0x6c   :  { %v404_v20 = vld [vmem:[#allocation4 + $0x940] sm:$0xff]  ;;  %763 = vmatpush.msrb.mxu3 %v604_v19  ;;  %v157_v19 = vld [vmem:[#allocation4 + $0x188] sm:$0xff] }
  0x6d   :  { %v468_v21 = vld [vmem:[#allocation4 + $0xb40] sm:$0xff]  ;;  %705 = vmatpush.msrb.mxu0 %v404_v20  ;;  %v221_v20 = vld [vmem:[#allocation4 + $0x388] sm:$0xff] }
  0x6e   :  { %v532_v22 = vld [vmem:[#allocation4 + $0xd40] sm:$0xff]  ;;  %725 = vmatpush.msrb.mxu1 %v468_v21  ;;  %v285_v21 = vld [vmem:[#allocation4 + $0x588] sm:$0xff] }
  0x6f   :  { %v600_v23 = vld [vmem:[#allocation4 + $0xf60] sm:$0xff]  ;;  %745 = vmatpush.msrb.mxu2 %v532_v22  ;;  %v353_v22 = vld [vmem:[#allocation4 + $0x7a8] sm:$0xff] }
  0x70   :  { %v400_v24 = vld [vmem:[#allocation4 + $0x920] sm:$0xff]  ;;  %764 = vmatpush.msrb.mxu3 %v600_v23 }
  0x71   :  { %v464_v25 = vld [vmem:[#allocation4 + $0xb20] sm:$0xff]  ;;  %706 = vmatpush.msrb.mxu0 %v400_v24  ;;  %v153_v24 = vld [vmem:[#allocation4 + $0x168] sm:$0xff] }
  0x72   :  { %v528_v26 = vld [vmem:[#allocation4 + $0xd20] sm:$0xff]  ;;  %726 = vmatpush.msrb.mxu1 %v464_v25  ;;  %v217_v25 = vld [vmem:[#allocation4 + $0x368] sm:$0xff] }
  0x73   :  { %v596_v27 = vld [vmem:[#allocation4 + $0xf40] sm:$0xff]  ;;  %746 = vmatpush.msrb.mxu2 %v528_v26  ;;  %v281_v26 = vld [vmem:[#allocation4 + $0x568] sm:$0xff] }
  0x74   :  { %v396_v28 = vld [vmem:[#allocation4 + $0x900] sm:$0xff]  ;;  %765 = vmatpush.msrb.mxu3 %v596_v27  ;;  %v349_v27 = vld [vmem:[#allocation4 + $0x788] sm:$0xff] }
  0x75   :  { %v460_v29 = vld [vmem:[#allocation4 + $0xb00] sm:$0xff]  ;;  %707 = vmatpush.msrb.mxu0 %v396_v28  ;;  %v149_v28 = vld [vmem:[#allocation4 + $0x148] sm:$0xff] }
  0x76   :  { %v524_v30 = vld [vmem:[#allocation4 + $0xd00] sm:$0xff]  ;;  %727 = vmatpush.msrb.mxu1 %v460_v29  ;;  %v213_v29 = vld [vmem:[#allocation4 + $0x348] sm:$0xff] }
  0x77   :  { %v592_v31 = vld [vmem:[#allocation4 + $0xf20] sm:$0xff]  ;;  %747 = vmatpush.msrb.mxu2 %v524_v30  ;;  %v277_v30 = vld [vmem:[#allocation4 + $0x548] sm:$0xff] }
  0x78   :  { %v392_v32 = vld [vmem:[#allocation4 + $0x8e0] sm:$0xff]  ;;  %766 = vmatpush.msrb.mxu3 %v592_v31  ;;  %v345_v31 = vld [vmem:[#allocation4 + $0x768] sm:$0xff] }
  0x79   :  { %v456_v33 = vld [vmem:[#allocation4 + $0xae0] sm:$0xff]  ;;  %708 = vmatpush.msrb.mxu0 %v392_v32  ;;  %v145_v32 = vld [vmem:[#allocation4 + $0x128] sm:$0xff] }
  0x7a   :  { %v520_v34 = vld [vmem:[#allocation4 + $0xce0] sm:$0xff]  ;;  %728 = vmatpush.msrb.mxu1 %v456_v33  ;;  %v209_v33 = vld [vmem:[#allocation4 + $0x328] sm:$0xff] }
  0x7b   :  { %v588_v35 = vld [vmem:[#allocation4 + $0xf00] sm:$0xff]  ;;  %748 = vmatpush.msrb.mxu2 %v520_v34  ;;  %v273_v34 = vld [vmem:[#allocation4 + $0x528] sm:$0xff] }
  0x7c   :  { %v388_v36 = vld [vmem:[#allocation4 + $0x8c0] sm:$0xff]  ;;  %767 = vmatpush.msrb.mxu3 %v588_v35  ;;  %v341_v35 = vld [vmem:[#allocation4 + $0x748] sm:$0xff] }
  0x7d   :  { %v452_v37 = vld [vmem:[#allocation4 + $0xac0] sm:$0xff]  ;;  %709 = vmatpush.msrb.mxu0 %v388_v36  ;;  %v141_v36 = vld [vmem:[#allocation4 + $0x108] sm:$0xff] }
  0x7e   :  { %v516_v38 = vld [vmem:[#allocation4 + $0xcc0] sm:$0xff]  ;;  %729 = vmatpush.msrb.mxu1 %v452_v37  ;;  %v205_v37 = vld [vmem:[#allocation4 + $0x308] sm:$0xff] }
  0x7f   :  { %v584_v39 = vld [vmem:[#allocation4 + $0xee0] sm:$0xff]  ;;  %749 = vmatpush.msrb.mxu2 %v516_v38  ;;  %v269_v38 = vld [vmem:[#allocation4 + $0x508] sm:$0xff] }
  0x80   :  { %v384_v40 = vld [vmem:[#allocation4 + $0x8a0] sm:$0xff]  ;;  %768 = vmatpush.msrb.mxu3 %v584_v39  ;;  %v337_v39 = vld [vmem:[#allocation4 + $0x728] sm:$0xff] }
  0x81   :  { %v448_v41 = vld [vmem:[#allocation4 + $0xaa0] sm:$0xff]  ;;  %710 = vmatpush.msrb.mxu0 %v384_v40  ;;  %v137_v40 = vld [vmem:[#allocation4 + $0xe8] sm:$0xff] }
  0x82   :  { %v512_v42 = vld [vmem:[#allocation4 + $0xca0] sm:$0xff]  ;;  %730 = vmatpush.msrb.mxu1 %v448_v41  ;;  %v201_v41 = vld [vmem:[#allocation4 + $0x2e8] sm:$0xff] }
  0x83   :  { %v580_v43 = vld [vmem:[#allocation4 + $0xec0] sm:$0xff]  ;;  %750 = vmatpush.msrb.mxu2 %v512_v42  ;;  %v265_v42 = vld [vmem:[#allocation4 + $0x4e8] sm:$0xff] }
  0x84   :  { %v380_v44 = vld [vmem:[#allocation4 + $0x880] sm:$0xff]  ;;  %769 = vmatpush.msrb.mxu3 %v580_v43  ;;  %v333_v43 = vld [vmem:[#allocation4 + $0x708] sm:$0xff] }
  0x85   :  { %v444_v45 = vld [vmem:[#allocation4 + $0xa80] sm:$0xff]  ;;  %711 = vmatpush.msrb.mxu0 %v380_v44  ;;  %v133_v44 = vld [vmem:[#allocation4 + $0xc8] sm:$0xff] }
  0x86   :  { %v508_v46 = vld [vmem:[#allocation4 + $0xc80] sm:$0xff]  ;;  %731 = vmatpush.msrb.mxu1 %v444_v45  ;;  %v197_v45 = vld [vmem:[#allocation4 + $0x2c8] sm:$0xff] }
  0x87   :  { %v576_v47 = vld [vmem:[#allocation4 + $0xea0] sm:$0xff]  ;;  %751 = vmatpush.msrb.mxu2 %v508_v46  ;;  %v261_v46 = vld [vmem:[#allocation4 + $0x4c8] sm:$0xff] }
  0x88   :  { %v376_v48 = vld [vmem:[#allocation4 + $0x860] sm:$0xff]  ;;  %770 = vmatpush.msrb.mxu3 %v576_v47  ;;  %v329_v47 = vld [vmem:[#allocation4 + $0x6e8] sm:$0xff] }
  0x89   :  { %v440_v49 = vld [vmem:[#allocation4 + $0xa60] sm:$0xff]  ;;  %712 = vmatpush.msrb.mxu0 %v376_v48  ;;  %v129_v48 = vld [vmem:[#allocation4 + $0xa8] sm:$0xff] }
  0x8a   :  { %v504_v50 = vld [vmem:[#allocation4 + $0xc60] sm:$0xff]  ;;  %732 = vmatpush.msrb.mxu1 %v440_v49  ;;  %v193_v49 = vld [vmem:[#allocation4 + $0x2a8] sm:$0xff] }
  0x8b   :  { %v572_v51 = vld [vmem:[#allocation4 + $0xe80] sm:$0xff]  ;;  %752 = vmatpush.msrb.mxu2 %v504_v50  ;;  %v257_v50 = vld [vmem:[#allocation4 + $0x4a8] sm:$0xff] }
  0x8c   :  { %v372_v52 = vld [vmem:[#allocation4 + $0x840] sm:$0xff]  ;;  %771 = vmatpush.msrb.mxu3 %v572_v51  ;;  %v325_v51 = vld [vmem:[#allocation4 + $0x6c8] sm:$0xff] }
  0x8d   :  { %v436_v53 = vld [vmem:[#allocation4 + $0xa40] sm:$0xff]  ;;  %713 = vmatpush.msrb.mxu0 %v372_v52  ;;  %v125_v52 = vld [vmem:[#allocation4 + $0x88] sm:$0xff] }
  0x8e   :  { %v500_v54 = vld [vmem:[#allocation4 + $0xc40] sm:$0xff]  ;;  %733 = vmatpush.msrb.mxu1 %v436_v53  ;;  %v189_v53 = vld [vmem:[#allocation4 + $0x288] sm:$0xff] }
  0x8f   :  { %v568_v55 = vld [vmem:[#allocation4 + $0xe60] sm:$0xff]  ;;  %753 = vmatpush.msrb.mxu2 %v500_v54  ;;  %v253_v54 = vld [vmem:[#allocation4 + $0x488] sm:$0xff] }
  0x90   :  { %v368_v57 = vld [vmem:[#allocation4 + $0x820] sm:$0xff]  ;;  %772 = vmatpush.msrb.mxu3 %v568_v55  ;;  %v321_v55 = vld [vmem:[#allocation4 + $0x6a8] sm:$0xff] }
  0x91   :  { %v432_v58 = vld [vmem:[#allocation4 + $0xa20] sm:$0xff]  ;;  %714 = vmatpush.msrb.mxu0 %v368_v57  ;;  %v121_v57 = vld [vmem:[#allocation4 + $0x68] sm:$0xff] }
  0x92   :  { %v496_v59 = vld [vmem:[#allocation4 + $0xc20] sm:$0xff]  ;;  %734 = vmatpush.msrb.mxu1 %v432_v58  ;;  %v185_v58 = vld [vmem:[#allocation4 + $0x268] sm:$0xff] }
  0x93   :  { %v564_v60 = vld [vmem:[#allocation4 + $0xe40] sm:$0xff]  ;;  %754 = vmatpush.msrb.mxu2 %v496_v59  ;;  %v249_v59 = vld [vmem:[#allocation4 + $0x468] sm:$0xff] }
  0x94   :  { %v1922_v61 = vld [vmem:[%s2067_s0] sm:$0xff]  ;;  %773 = vmatpush.msrb.mxu3 %v564_v60  ;;  %v1934_v3 = vld [vmem:[%s2067_s0 + $0x8] sm:$0xff] }
  0x95   :  { %v364_v63 = vld [vmem:[#allocation4 + $0x800] sm:$0xff]  ;;  %636 = vmatmul.f32.vlgmr.msra.gmra.mxu0 %v1922_v61  ;;  %656 = vmatmul.f32.vlgmr.msra.gmra.mxu1 %v1934_v3  ;;  %v317_v60 = vld [vmem:[#allocation4 + $0x688] sm:$0xff] }
  0x96   :  { %v428_v0 = vld [vmem:[#allocation4 + $0xa00] sm:$0xff]  ;;  %715 = vmatpush.msrb.mxu0 %v364_v63  ;;  %v117_v63 = vld [vmem:[#allocation4 + $0x48] sm:$0xff] }
  0x97   :  { %v492_v1 = vld [vmem:[#allocation4 + $0xc00] sm:$0xff]  ;;  %735 = vmatpush.msrb.mxu1 %v428_v0  ;;  %v181_v0 = vld [vmem:[#allocation4 + $0x248] sm:$0xff] }
  0x98   :  { %v560_v2 = vld [vmem:[#allocation4 + $0xe20] sm:$0xff]  ;;  %755 = vmatpush.msrb.mxu2 %v492_v1  ;;  %780 = vmatpush.msra.mxu0 %v169_v4  ;;  %v245_v1 = vld [vmem:[#allocation4 + $0x448] sm:$0xff] }
  0x99   :  { %v556_v7 = vld [vmem:[#allocation4 + $0xe00] sm:$0xff]  ;;  %774 = vmatpush.msrb.mxu3 %v560_v2  ;;  %800 = vmatpush.msra.mxu1 %v233_v5  ;;  %v313_v2 = vld [vmem:[#allocation4 + $0x668] sm:$0xff] }
  0x9a   :  { %820 = vmatpush.msra.mxu2 %v297_v6  ;;  %781 = vmatpush.msra.mxu0 %v165_v8  ;;  %v1946_v17 = vld [vmem:[%s2067_s0 + $0x20] sm:$0xff]  ;;  %v1958_v23 = vld [vmem:[%s2067_s0 + $0x28] sm:$0xff] }
  0x9b   :  { %775 = vmatpush.msrb.mxu3 %v556_v7  ;;  %801 = vmatpush.msra.mxu1 %v229_v9  ;;  %v113_v4 = vld [vmem:[#allocation4 + $0x28] sm:$0xff] }
  0x9c   :  { %821 = vmatpush.msra.mxu2 %v293_v10  ;;  %782 = vmatpush.msra.mxu0 %v161_v13  ;;  %v177_v5 = vld [vmem:[#allocation4 + $0x228] sm:$0xff] }
  0x9d   :  { %840 = vmatpush.msra.mxu3 %v361_v11  ;;  %756 = vmatmul.f32.vlgmr.msrb.gmra.mxu2 %v1941_v12  ;;  %v241_v6 = vld [vmem:[#allocation4 + $0x428] sm:$0xff] }
  0x9e   :  { %802 = vmatpush.msra.mxu1 %v225_v14  ;;  %822 = vmatpush.msra.mxu2 %v289_v15  ;;  %v309_v7 = vld [vmem:[#allocation4 + $0x648] sm:$0xff] }
  0x9f   :  { %841 = vmatpush.msra.mxu3 %v357_v16  ;;  %716 = vmatmul.f32.vlgmr.msrb.gmra.mxu0 %v1946_v17  ;;  %v109_v8 = vld [vmem:[#allocation4 + $0x8] sm:$0xff] }
  0xa0   :  { %776 = vmatmul.f32.vlgmr.msrb.gmra.mxu3 %v1952_v18  ;;  %783 = vmatpush.msra.mxu0 %v157_v19  ;;  %v173_v9 = vld [vmem:[#allocation4 + $0x208] sm:$0xff] }
  0xa1   :  { %803 = vmatpush.msra.mxu1 %v221_v20  ;;  %823 = vmatpush.msra.mxu2 %v285_v21  ;;  %v237_v10 = vld [vmem:[#allocation4 + $0x408] sm:$0xff] }
  0xa2   :  { %842 = vmatpush.msra.mxu3 %v353_v22  ;;  %736 = vmatmul.f32.vlgmr.msrb.gmra.mxu1 %v1958_v23  ;;  %v305_v11 = vld [vmem:[#allocation4 + $0x628] sm:$0xff] }
  0xa3   :  { %784 = vmatpush.msra.mxu0 %v153_v24  ;;  %804 = vmatpush.msra.mxu1 %v217_v25  ;;  %v425_v13 = vld [vmem:[#allocation4 + $0x9e8] sm:$0xff] }
  0xa4   :  { %824 = vmatpush.msra.mxu2 %v281_v26  ;;  %843 = vmatpush.msra.mxu3 %v349_v27  ;;  %v489_v14 = vld [vmem:[#allocation4 + $0xbe8] sm:$0xff] }
  0xa5   :  { %785 = vmatpush.msra.mxu0 %v149_v28  ;;  %805 = vmatpush.msra.mxu1 %v213_v29  ;;  %v553_v15 = vld [vmem:[#allocation4 + $0xde8] sm:$0xff] }
  0xa6   :  { %825 = vmatpush.msra.mxu2 %v277_v30  ;;  %844 = vmatpush.msra.mxu3 %v345_v31  ;;  %v301_v16 = vld [vmem:[#allocation4 + $0x608] sm:$0xff] }
  0xa7   :  { %786 = vmatpush.msra.mxu0 %v145_v32  ;;  %806 = vmatpush.msra.mxu1 %v209_v33  ;;  %v421_v19 = vld [vmem:[#allocation4 + $0x9c8] sm:$0xff] }
  0xa8   :  { %826 = vmatpush.msra.mxu2 %v273_v34  ;;  %845 = vmatpush.msra.mxu3 %v341_v35  ;;  %v485_v20 = vld [vmem:[#allocation4 + $0xbc8] sm:$0xff] }
  0xa9   :  { %787 = vmatpush.msra.mxu0 %v141_v36  ;;  %807 = vmatpush.msra.mxu1 %v205_v37  ;;  %v549_v21 = vld [vmem:[#allocation4 + $0xdc8] sm:$0xff] }
  0xaa   :  { %827 = vmatpush.msra.mxu2 %v269_v38  ;;  %846 = vmatpush.msra.mxu3 %v337_v39  ;;  %v617_v22 = vld [vmem:[#allocation4 + $0xfe8] sm:$0xff] }
  0xab   :  { %788 = vmatpush.msra.mxu0 %v137_v40  ;;  %808 = vmatpush.msra.mxu1 %v201_v41  ;;  %v417_v24 = vld [vmem:[#allocation4 + $0x9a8] sm:$0xff] }
  0xac   :  { %828 = vmatpush.msra.mxu2 %v265_v42  ;;  %847 = vmatpush.msra.mxu3 %v333_v43  ;;  %v481_v25 = vld [vmem:[#allocation4 + $0xba8] sm:$0xff] }
  0xad   :  { %789 = vmatpush.msra.mxu0 %v133_v44  ;;  %809 = vmatpush.msra.mxu1 %v197_v45  ;;  %v545_v26 = vld [vmem:[#allocation4 + $0xda8] sm:$0xff] }
  0xae   :  { %829 = vmatpush.msra.mxu2 %v261_v46  ;;  %848 = vmatpush.msra.mxu3 %v329_v47  ;;  %v613_v27 = vld [vmem:[#allocation4 + $0xfc8] sm:$0xff] }
  0xaf   :  { %790 = vmatpush.msra.mxu0 %v129_v48  ;;  %810 = vmatpush.msra.mxu1 %v193_v49  ;;  %v413_v28 = vld [vmem:[#allocation4 + $0x988] sm:$0xff] }
  0xb0   :  { %830 = vmatpush.msra.mxu2 %v257_v50  ;;  %849 = vmatpush.msra.mxu3 %v325_v51  ;;  %v477_v29 = vld [vmem:[#allocation4 + $0xb88] sm:$0xff] }
  0xb1   :  { %791 = vmatpush.msra.mxu0 %v125_v52  ;;  %811 = vmatpush.msra.mxu1 %v189_v53  ;;  %v541_v30 = vld [vmem:[#allocation4 + $0xd88] sm:$0xff] }
  0xb2   :  { %831 = vmatpush.msra.mxu2 %v253_v54  ;;  %850 = vmatpush.msra.mxu3 %v321_v55  ;;  %v609_v31 = vld [vmem:[#allocation4 + $0xfa8] sm:$0xff] }
  0xb3   :  { %792 = vmatpush.msra.mxu0 %v121_v57  ;;  %812 = vmatpush.msra.mxu1 %v185_v58  ;;  %v409_v32 = vld [vmem:[#allocation4 + $0x968] sm:$0xff] }
  0xb4   :  { %832 = vmatpush.msra.mxu2 %v249_v59  ;;  %851 = vmatpush.msra.mxu3 %v317_v60  ;;  %v473_v33 = vld [vmem:[#allocation4 + $0xb68] sm:$0xff] }
  0xb5   :  { %793 = vmatpush.msra.mxu0 %v117_v63  ;;  %813 = vmatpush.msra.mxu1 %v181_v0  ;;  %v537_v34 = vld [vmem:[#allocation4 + $0xd68] sm:$0xff] }
  0xb6   :  { %833 = vmatpush.msra.mxu2 %v245_v1  ;;  %852 = vmatpush.msra.mxu3 %v313_v2  ;;  %v605_v35 = vld [vmem:[#allocation4 + $0xf88] sm:$0xff] }
  0xb7   :  { %794 = vmatpush.msra.mxu0 %v113_v4  ;;  %814 = vmatpush.msra.mxu1 %v177_v5  ;;  %v405_v36 = vld [vmem:[#allocation4 + $0x948] sm:$0xff] }
  0xb8   :  { %834 = vmatpush.msra.mxu2 %v241_v6  ;;  %853 = vmatpush.msra.mxu3 %v309_v7  ;;  %v469_v37 = vld [vmem:[#allocation4 + $0xb48] sm:$0xff] }
  0xb9   :  { %795 = vmatpush.msra.mxu0 %v109_v8  ;;  %815 = vmatpush.msra.mxu1 %v173_v9  ;;  %v533_v38 = vld [vmem:[#allocation4 + $0xd48] sm:$0xff] }
  0xba   :  { %835 = vmatpush.msra.mxu2 %v237_v10  ;;  %854 = vmatpush.msra.mxu3 %v305_v11  ;;  %v601_v39 = vld [vmem:[#allocation4 + $0xf68] sm:$0xff] }
  0xbb   :  { %860 = vmatpush.msrb.mxu0 %v425_v13  ;;  %880 = vmatpush.msrb.mxu1 %v489_v14  ;;  %v401_v40 = vld [vmem:[#allocation4 + $0x928] sm:$0xff] }
  0xbc   :  { %900 = vmatpush.msrb.mxu2 %v553_v15  ;;  %855 = vmatpush.msra.mxu3 %v301_v16  ;;  %v465_v41 = vld [vmem:[#allocation4 + $0xb28] sm:$0xff] }
  0xbd   :  { %861 = vmatpush.msrb.mxu0 %v421_v19  ;;  %881 = vmatpush.msrb.mxu1 %v485_v20  ;;  %v529_v42 = vld [vmem:[#allocation4 + $0xd28] sm:$0xff] }
  0xbe   :  { %901 = vmatpush.msrb.mxu2 %v549_v21  ;;  %920 = vmatpush.msrb.mxu3 %v617_v22  ;;  %v597_v43 = vld [vmem:[#allocation4 + $0xf48] sm:$0xff] }
  0xbf   :  { %862 = vmatpush.msrb.mxu0 %v417_v24  ;;  %882 = vmatpush.msrb.mxu1 %v481_v25  ;;  %v397_v44 = vld [vmem:[#allocation4 + $0x908] sm:$0xff]  ;;  %v170_v24 = vld [vmem:[#allocation4 + $0x1f0] sm:$0xff] }
  0xc0   :  { %902 = vmatpush.msrb.mxu2 %v545_v26  ;;  %921 = vmatpush.msrb.mxu3 %v613_v27  ;;  %v461_v45 = vld [vmem:[#allocation4 + $0xb08] sm:$0xff]  ;;  %v234_v25 = vld [vmem:[#allocation4 + $0x3f0] sm:$0xff] }
  0xc1   :  { %863 = vmatpush.msrb.mxu0 %v413_v28  ;;  %883 = vmatpush.msrb.mxu1 %v477_v29  ;;  %v525_v46 = vld [vmem:[#allocation4 + $0xd08] sm:$0xff]  ;;  %v298_v26 = vld [vmem:[#allocation4 + $0x5f0] sm:$0xff] }
  0xc2   :  { %903 = vmatpush.msrb.mxu2 %v541_v30  ;;  %922 = vmatpush.msrb.mxu3 %v609_v31  ;;  %v593_v47 = vld [vmem:[#allocation4 + $0xf28] sm:$0xff]  ;;  %v230_v28 = vld [vmem:[#allocation4 + $0x3d0] sm:$0xff] }
  0xc3   :  { %864 = vmatpush.msrb.mxu0 %v409_v32  ;;  %884 = vmatpush.msrb.mxu1 %v473_v33  ;;  %v393_v48 = vld [vmem:[#allocation4 + $0x8e8] sm:$0xff]  ;;  %v294_v29 = vld [vmem:[#allocation4 + $0x5d0] sm:$0xff] }
  0xc4   :  { %904 = vmatpush.msrb.mxu2 %v537_v34  ;;  %923 = vmatpush.msrb.mxu3 %v605_v35  ;;  %v457_v49 = vld [vmem:[#allocation4 + $0xae8] sm:$0xff]  ;;  %v362_v30 = vld [vmem:[#allocation4 + $0x7f0] sm:$0xff] }
  0xc5   :  { %865 = vmatpush.msrb.mxu0 %v405_v36  ;;  %885 = vmatpush.msrb.mxu1 %v469_v37  ;;  %v521_v50 = vld [vmem:[#allocation4 + $0xce8] sm:$0xff]  ;;  %v290_v31 = vld [vmem:[#allocation4 + $0x5b0] sm:$0xff] }
  0xc6   :  { %905 = vmatpush.msrb.mxu2 %v533_v38  ;;  %924 = vmatpush.msrb.mxu3 %v601_v39  ;;  %v589_v51 = vld [vmem:[#allocation4 + $0xf08] sm:$0xff]  ;;  %v358_v32 = vld [vmem:[#allocation4 + $0x7d0] sm:$0xff] }
  0xc7   :  { %866 = vmatpush.msrb.mxu0 %v401_v40  ;;  %886 = vmatpush.msrb.mxu1 %v465_v41  ;;  %v389_v52 = vld [vmem:[#allocation4 + $0x8c8] sm:$0xff]  ;;  %v222_v33 = vld [vmem:[#allocation4 + $0x390] sm:$0xff] }
  0xc8   :  { %906 = vmatpush.msrb.mxu2 %v529_v42  ;;  %925 = vmatpush.msrb.mxu3 %v597_v43  ;;  %v453_v53 = vld [vmem:[#allocation4 + $0xac8] sm:$0xff]  ;;  %v286_v34 = vld [vmem:[#allocation4 + $0x590] sm:$0xff] }
  0xc9   :  { %867 = vmatpush.msrb.mxu0 %v397_v44  ;;  %887 = vmatpush.msrb.mxu1 %v461_v45  ;;  %v517_v54 = vld [vmem:[#allocation4 + $0xcc8] sm:$0xff]  ;;  %v354_v35 = vld [vmem:[#allocation4 + $0x7b0] sm:$0xff] }
  0xca   :  { %907 = vmatpush.msrb.mxu2 %v525_v46  ;;  %926 = vmatpush.msrb.mxu3 %v593_v47  ;;  %v585_v55 = vld [vmem:[#allocation4 + $0xee8] sm:$0xff]  ;;  %v154_v36 = vld [vmem:[#allocation4 + $0x170] sm:$0xff] }
  0xcb   :  { %868 = vmatpush.msrb.mxu0 %v393_v48  ;;  %888 = vmatpush.msrb.mxu1 %v457_v49  ;;  %v385_v57 = vld [vmem:[#allocation4 + $0x8a8] sm:$0xff]  ;;  %v218_v37 = vld [vmem:[#allocation4 + $0x370] sm:$0xff] }
  0xcc   :  { %908 = vmatpush.msrb.mxu2 %v521_v50  ;;  %927 = vmatpush.msrb.mxu3 %v589_v51  ;;  %v449_v58 = vld [vmem:[#allocation4 + $0xaa8] sm:$0xff]  ;;  %v282_v38 = vld [vmem:[#allocation4 + $0x570] sm:$0xff] }
  0xcd   :  { %869 = vmatpush.msrb.mxu0 %v389_v52  ;;  %889 = vmatpush.msrb.mxu1 %v453_v53  ;;  %v513_v59 = vld [vmem:[#allocation4 + $0xca8] sm:$0xff]  ;;  %v350_v39 = vld [vmem:[#allocation4 + $0x790] sm:$0xff] }
  0xce   :  { %v581_v60 = vld [vmem:[#allocation4 + $0xec8] sm:$0xff]  ;;  %909 = vmatpush.msrb.mxu2 %v517_v54  ;;  %928 = vmatpush.msrb.mxu3 %v585_v55  ;;  %v214_v40 = vld [vmem:[#allocation4 + $0x350] sm:$0xff] }
  0xcf   :  { %v381_v63 = vld [vmem:[#allocation4 + $0x888] sm:$0xff]  ;;  %870 = vmatpush.msrb.mxu0 %v385_v57  ;;  %890 = vmatpush.msrb.mxu1 %v449_v58  ;;  %v278_v41 = vld [vmem:[#allocation4 + $0x550] sm:$0xff] }
  0xd0   :  { %v445_v0 = vld [vmem:[#allocation4 + $0xa88] sm:$0xff]  ;;  %910 = vmatpush.msrb.mxu2 %v513_v59  ;;  %929 = vmatpush.msrb.mxu3 %v581_v60  ;;  %v346_v42 = vld [vmem:[#allocation4 + $0x770] sm:$0xff] }
  0xd1   :  { %v509_v1 = vld [vmem:[#allocation4 + $0xc88] sm:$0xff]  ;;  %871 = vmatpush.msrb.mxu0 %v381_v63  ;;  %891 = vmatpush.msrb.mxu1 %v445_v0  ;;  %v274_v43 = vld [vmem:[#allocation4 + $0x530] sm:$0xff] }
  0xd2   :  { %v577_v2 = vld [vmem:[#allocation4 + $0xea8] sm:$0xff]  ;;  %911 = vmatpush.msrb.mxu2 %v509_v1  ;;  %796 = vmatmul.f32.vlgmr.msra.gmra.mxu0 %v1922_v61  ;;  %v162_v61 = vld [vmem:[#allocation4 + $0x1b0] sm:$0xff] }
  0xd3   :  { %v377_v4 = vld [vmem:[#allocation4 + $0x868] sm:$0xff]  ;;  %930 = vmatpush.msrb.mxu3 %v577_v2  ;;  %836 = vmatmul.f32.vlgmr.msra.gmra.mxu2 %v1917_v56  ;;  %v166_v56 = vld [vmem:[#allocation4 + $0x1d0] sm:$0xff] }
  0xd4   :  { %v441_v5 = vld [vmem:[#allocation4 + $0xa68] sm:$0xff]  ;;  %872 = vmatpush.msrb.mxu0 %v377_v4  ;;  %856 = vmatmul.f32.vlgmr.msra.gmra.mxu3 %v1928_v62  ;;  %v226_v62 = vld [vmem:[#allocation4 + $0x3b0] sm:$0xff] }
  0xd5   :  { %v505_v6 = vld [vmem:[#allocation4 + $0xc68] sm:$0xff]  ;;  %892 = vmatpush.msrb.mxu1 %v441_v5  ;;  %v342_v44 = vld [vmem:[#allocation4 + $0x750] sm:$0xff] }
  0xd6   :  { %v573_v7 = vld [vmem:[#allocation4 + $0xe88] sm:$0xff]  ;;  %912 = vmatpush.msrb.mxu2 %v505_v6  ;;  %816 = vmatmul.f32.vlgmr.msra.gmra.mxu1 %v1934_v3  ;;  %v158_v3 = vld [vmem:[#allocation4 + $0x190] sm:$0xff] }
  0xd7   :  { %v373_v8 = vld [vmem:[#allocation4 + $0x848] sm:$0xff]  ;;  %931 = vmatpush.msrb.mxu3 %v573_v7  ;;  %v142_v45 = vld [vmem:[#allocation4 + $0x110] sm:$0xff] }
  0xd8   :  { %v437_v9 = vld [vmem:[#allocation4 + $0xa48] sm:$0xff]  ;;  %873 = vmatpush.msrb.mxu0 %v373_v8  ;;  %v206_v46 = vld [vmem:[#allocation4 + $0x310] sm:$0xff] }
  0xd9   :  { %v501_v10 = vld [vmem:[#allocation4 + $0xc48] sm:$0xff]  ;;  %893 = vmatpush.msrb.mxu1 %v437_v9  ;;  %v338_v47 = vld [vmem:[#allocation4 + $0x730] sm:$0xff] }
  0xda   :  { %v569_v11 = vld [vmem:[#allocation4 + $0xe68] sm:$0xff]  ;;  %913 = vmatpush.msrb.mxu2 %v501_v10  ;;  %v138_v48 = vld [vmem:[#allocation4 + $0xf0] sm:$0xff] }
  0xdb   :  { %v369_v13 = vld [vmem:[#allocation4 + $0x828] sm:$0xff]  ;;  %932 = vmatpush.msrb.mxu3 %v569_v11  ;;  %v202_v49 = vld [vmem:[#allocation4 + $0x2f0] sm:$0xff] }
  0xdc   :  { %v433_v14 = vld [vmem:[#allocation4 + $0xa28] sm:$0xff]  ;;  %874 = vmatpush.msrb.mxu0 %v369_v13  ;;  %v266_v50 = vld [vmem:[#allocation4 + $0x4f0] sm:$0xff] }
  0xdd   :  { %v497_v15 = vld [vmem:[#allocation4 + $0xc28] sm:$0xff]  ;;  %894 = vmatpush.msrb.mxu1 %v433_v14  ;;  %v334_v51 = vld [vmem:[#allocation4 + $0x710] sm:$0xff] }
  0xde   :  { %v565_v16 = vld [vmem:[#allocation4 + $0xe48] sm:$0xff]  ;;  %914 = vmatpush.msrb.mxu2 %v497_v15  ;;  %v134_v52 = vld [vmem:[#allocation4 + $0xd0] sm:$0xff] }
  0xdf   :  { %v365_v19 = vld [vmem:[#allocation4 + $0x808] sm:$0xff]  ;;  %933 = vmatpush.msrb.mxu3 %v565_v16  ;;  %v198_v53 = vld [vmem:[#allocation4 + $0x2d0] sm:$0xff] }
  0xe0   :  { %v429_v20 = vld [vmem:[#allocation4 + $0xa08] sm:$0xff]  ;;  %875 = vmatpush.msrb.mxu0 %v365_v19  ;;  %v262_v54 = vld [vmem:[#allocation4 + $0x4d0] sm:$0xff] }
  0xe1   :  { %v493_v21 = vld [vmem:[#allocation4 + $0xc08] sm:$0xff]  ;;  %895 = vmatpush.msrb.mxu1 %v429_v20  ;;  %876 = vmatmul.f32.vlgmr.msrb.gmra.mxu0 %v1946_v17  ;;  %v146_v17 = vld [vmem:[#allocation4 + $0x130] sm:$0xff] }
  0xe2   :  { %v561_v22 = vld [vmem:[#allocation4 + $0xe28] sm:$0xff]  ;;  %915 = vmatpush.msrb.mxu2 %v493_v21  ;;  %940 = vmatpush.msra.mxu0 %v170_v24  ;;  %v330_v55 = vld [vmem:[#allocation4 + $0x6f0] sm:$0xff] }
  0xe3   :  { %v557_v27 = vld [vmem:[#allocation4 + $0xe08] sm:$0xff]  ;;  %934 = vmatpush.msrb.mxu3 %v561_v22  ;;  %960 = vmatpush.msra.mxu1 %v234_v25  ;;  %v130_v57 = vld [vmem:[#allocation4 + $0xb0] sm:$0xff] }
  0xe4   :  { %980 = vmatpush.msra.mxu2 %v298_v26  ;;  %941 = vmatpush.msra.mxu0 %v166_v56  ;;  %v194_v58 = vld [vmem:[#allocation4 + $0x2b0] sm:$0xff] }
  0xe5   :  { %935 = vmatpush.msrb.mxu3 %v557_v27  ;;  %961 = vmatpush.msra.mxu1 %v230_v28  ;;  %v258_v59 = vld [vmem:[#allocation4 + $0x4b0] sm:$0xff] }
  0xe6   :  { %981 = vmatpush.msra.mxu2 %v294_v29  ;;  %942 = vmatpush.msra.mxu0 %v162_v61  ;;  %v326_v60 = vld [vmem:[#allocation4 + $0x6d0] sm:$0xff] }
  0xe7   :  { %1000 = vmatpush.msra.mxu3 %v362_v30  ;;  %916 = vmatmul.f32.vlgmr.msrb.gmra.mxu2 %v1941_v12  ;;  %v150_v12 = vld [vmem:[#allocation4 + $0x150] sm:$0xff] }
  0xe8   :  { %962 = vmatpush.msra.mxu1 %v226_v62  ;;  %982 = vmatpush.msra.mxu2 %v290_v31  ;;  %v126_v63 = vld [vmem:[#allocation4 + $0x90] sm:$0xff] }
  0xe9   :  { %1001 = vmatpush.msra.mxu3 %v358_v32  ;;  %943 = vmatpush.msra.mxu0 %v158_v3  ;;  %v190_v0 = vld [vmem:[#allocation4 + $0x290] sm:$0xff] }
  0xea   :  { %936 = vmatmul.f32.vlgmr.msrb.gmra.mxu3 %v1952_v18  ;;  %963 = vmatpush.msra.mxu1 %v222_v33  ;;  %v210_v18 = vld [vmem:[#allocation4 + $0x330] sm:$0xff] }
  0xeb   :  { %983 = vmatpush.msra.mxu2 %v286_v34  ;;  %1002 = vmatpush.msra.mxu3 %v354_v35  ;;  %v254_v1 = vld [vmem:[#allocation4 + $0x490] sm:$0xff] }
  0xec   :  { %896 = vmatmul.f32.vlgmr.msrb.gmra.mxu1 %v1958_v23  ;;  %944 = vmatpush.msra.mxu0 %v154_v36  ;;  %v270_v23 = vld [vmem:[#allocation4 + $0x510] sm:$0xff] }
  0xed   :  { %964 = vmatpush.msra.mxu1 %v218_v37  ;;  %984 = vmatpush.msra.mxu2 %v282_v38  ;;  %v322_v2 = vld [vmem:[#allocation4 + $0x6b0] sm:$0xff] }
  0xee   :  { %1003 = vmatpush.msra.mxu3 %v350_v39  ;;  %945 = vmatpush.msra.mxu0 %v150_v12  ;;  %v122_v4 = vld [vmem:[#allocation4 + $0x70] sm:$0xff] }
  0xef   :  { %965 = vmatpush.msra.mxu1 %v214_v40  ;;  %985 = vmatpush.msra.mxu2 %v278_v41  ;;  %v186_v5 = vld [vmem:[#allocation4 + $0x270] sm:$0xff] }
  0xf0   :  { %1004 = vmatpush.msra.mxu3 %v346_v42  ;;  %946 = vmatpush.msra.mxu0 %v146_v17  ;;  %v250_v6 = vld [vmem:[#allocation4 + $0x470] sm:$0xff] }
  0xf1   :  { %966 = vmatpush.msra.mxu1 %v210_v18  ;;  %986 = vmatpush.msra.mxu2 %v274_v43  ;;  %v318_v7 = vld [vmem:[#allocation4 + $0x690] sm:$0xff] }
  0xf2   :  { %1005 = vmatpush.msra.mxu3 %v342_v44  ;;  %947 = vmatpush.msra.mxu0 %v142_v45  ;;  %v118_v8 = vld [vmem:[#allocation4 + $0x50] sm:$0xff] }
  0xf3   :  { %967 = vmatpush.msra.mxu1 %v206_v46  ;;  %987 = vmatpush.msra.mxu2 %v270_v23  ;;  %v182_v9 = vld [vmem:[#allocation4 + $0x250] sm:$0xff] }
  0xf4   :  { %1006 = vmatpush.msra.mxu3 %v338_v47  ;;  %948 = vmatpush.msra.mxu0 %v138_v48  ;;  %v246_v10 = vld [vmem:[#allocation4 + $0x450] sm:$0xff] }
  0xf5   :  { %968 = vmatpush.msra.mxu1 %v202_v49  ;;  %988 = vmatpush.msra.mxu2 %v266_v50  ;;  %v314_v11 = vld [vmem:[#allocation4 + $0x670] sm:$0xff] }
  0xf6   :  { %1007 = vmatpush.msra.mxu3 %v334_v51  ;;  %949 = vmatpush.msra.mxu0 %v134_v52  ;;  %v114_v13 = vld [vmem:[#allocation4 + $0x30] sm:$0xff] }
  0xf7   :  { %969 = vmatpush.msra.mxu1 %v198_v53  ;;  %989 = vmatpush.msra.mxu2 %v262_v54  ;;  %v178_v14 = vld [vmem:[#allocation4 + $0x230] sm:$0xff] }
  0xf8   :  { %1008 = vmatpush.msra.mxu3 %v330_v55  ;;  %950 = vmatpush.msra.mxu0 %v130_v57  ;;  %v242_v15 = vld [vmem:[#allocation4 + $0x430] sm:$0xff] }
  0xf9   :  { %970 = vmatpush.msra.mxu1 %v194_v58  ;;  %990 = vmatpush.msra.mxu2 %v258_v59  ;;  %v310_v16 = vld [vmem:[#allocation4 + $0x650] sm:$0xff] }
  0xfa   :  { %1009 = vmatpush.msra.mxu3 %v326_v60  ;;  %951 = vmatpush.msra.mxu0 %v126_v63  ;;  %v110_v19 = vld [vmem:[#allocation4 + $0x10] sm:$0xff] }
  0xfb   :  { %971 = vmatpush.msra.mxu1 %v190_v0  ;;  %991 = vmatpush.msra.mxu2 %v254_v1  ;;  %v174_v20 = vld [vmem:[#allocation4 + $0x210] sm:$0xff] }
  0xfc   :  { %1010 = vmatpush.msra.mxu3 %v322_v2  ;;  %952 = vmatpush.msra.mxu0 %v122_v4  ;;  %v238_v21 = vld [vmem:[#allocation4 + $0x410] sm:$0xff] }
  0xfd   :  { %972 = vmatpush.msra.mxu1 %v186_v5  ;;  %992 = vmatpush.msra.mxu2 %v250_v6  ;;  %v306_v22 = vld [vmem:[#allocation4 + $0x630] sm:$0xff] }
  0xfe   :  { %1011 = vmatpush.msra.mxu3 %v318_v7  ;;  %953 = vmatpush.msra.mxu0 %v118_v8  ;;  %v426_v24 = vld [vmem:[#allocation4 + $0x9f0] sm:$0xff] }
  0xff   :  { %973 = vmatpush.msra.mxu1 %v182_v9  ;;  %993 = vmatpush.msra.mxu2 %v246_v10  ;;  %v490_v25 = vld [vmem:[#allocation4 + $0xbf0] sm:$0xff] }
 0x100   :  { %1012 = vmatpush.msra.mxu3 %v314_v11  ;;  %954 = vmatpush.msra.mxu0 %v114_v13  ;;  %v554_v26 = vld [vmem:[#allocation4 + $0xdf0] sm:$0xff]  ;;  %v1979_v13 = vld [vmem:[%s2067_s0] sm:$0xff] }
 0x101   :  { %974 = vmatpush.msra.mxu1 %v178_v14  ;;  %994 = vmatpush.msra.mxu2 %v242_v15  ;;  %v302_v27 = vld [vmem:[#allocation4 + $0x610] sm:$0xff] }
 0x102   :  { %1013 = vmatpush.msra.mxu3 %v310_v16  ;;  %955 = vmatpush.msra.mxu0 %v110_v19  ;;  %v422_v56 = vld [vmem:[#allocation4 + $0x9d0] sm:$0xff] }
 0x103   :  { %975 = vmatpush.msra.mxu1 %v174_v20  ;;  %995 = vmatpush.msra.mxu2 %v238_v21  ;;  %v486_v28 = vld [vmem:[#allocation4 + $0xbd0] sm:$0xff] }
 0x104   :  { %1014 = vmatpush.msra.mxu3 %v306_v22  ;;  %1020 = vmatpush.msrb.mxu0 %v426_v24  ;;  %v550_v29 = vld [vmem:[#allocation4 + $0xdd0] sm:$0xff]  ;;  %v1991_v22 = vld [vmem:[%s2067_s0 + $0x8] sm:$0xff] }
 0x105   :  { %1040 = vmatpush.msrb.mxu1 %v490_v25  ;;  %v618_v30 = vld [vmem:[#allocation4 + $0xff0] sm:$0xff]  ;;  %1060 = vmatpush.msrb.mxu2 %v554_v26 }
 0x106   :  { %1015 = vmatpush.msra.mxu3 %v302_v27  ;;  %v418_v61 = vld [vmem:[#allocation4 + $0x9b0] sm:$0xff]  ;;  %1021 = vmatpush.msrb.mxu0 %v422_v56  ;;  %v171_v56 = vld [vmem:[#allocation4 + $0x1f8] sm:$0xff] }
 0x107   :  { %v482_v62 = vld [vmem:[#allocation4 + $0xbb0] sm:$0xff]  ;;  %1041 = vmatpush.msrb.mxu1 %v486_v28  ;;  %1061 = vmatpush.msrb.mxu2 %v550_v29  ;;  %v235_v28 = vld [vmem:[#allocation4 + $0x3f8] sm:$0xff] }
 0x108   :  { %v546_v31 = vld [vmem:[#allocation4 + $0xdb0] sm:$0xff]  ;;  %1080 = vmatpush.msrb.mxu3 %v618_v30  ;;  %1022 = vmatpush.msrb.mxu0 %v418_v61  ;;  %v299_v29 = vld [vmem:[#allocation4 + $0x5f8] sm:$0xff] }
 0x109   :  { %v614_v32 = vld [vmem:[#allocation4 + $0xfd0] sm:$0xff]  ;;  %1042 = vmatpush.msrb.mxu1 %v482_v62  ;;  %1062 = vmatpush.msrb.mxu2 %v546_v31  ;;  %v167_v62 = vld [vmem:[#allocation4 + $0x1d8] sm:$0xff] }
 0x10a   :  { %v414_v3 = vld [vmem:[#allocation4 + $0x990] sm:$0xff]  ;;  %1081 = vmatpush.msrb.mxu3 %v614_v32  ;;  %956 = vmatmul.f32.vlgmr.msra.gmra.mxu0 %v1979_v13  ;;  %v231_v31 = vld [vmem:[#allocation4 + $0x3d8] sm:$0xff] }
 0x10b   :  { %v478_v33 = vld [vmem:[#allocation4 + $0xb90] sm:$0xff]  ;;  %1023 = vmatpush.msrb.mxu0 %v414_v3  ;;  %976 = vmatmul.f32.vlgmr.msra.gmra.mxu1 %v1991_v22  ;;  %v295_v32 = vld [vmem:[#allocation4 + $0x5d8] sm:$0xff] }
 0x10c   :  { %v542_v34 = vld [vmem:[#allocation4 + $0xd90] sm:$0xff]  ;;  %1043 = vmatpush.msrb.mxu1 %v478_v33  ;;  %v2003_v3 = vld [vmem:[%s2067_s0 + $0x20] sm:$0xff] }
 0x10d   :  { %v610_v35 = vld [vmem:[#allocation4 + $0xfb0] sm:$0xff]  ;;  %1063 = vmatpush.msrb.mxu2 %v542_v34  ;;  %v363_v33 = vld [vmem:[#allocation4 + $0x7f8] sm:$0xff] }
 0x10e   :  { %v410_v36 = vld [vmem:[#allocation4 + $0x970] sm:$0xff]  ;;  %1082 = vmatpush.msrb.mxu3 %v610_v35  ;;  %v163_v35 = vld [vmem:[#allocation4 + $0x1b8] sm:$0xff] }
 0x10f   :  { %v474_v37 = vld [vmem:[#allocation4 + $0xb70] sm:$0xff]  ;;  %1024 = vmatpush.msrb.mxu0 %v410_v36  ;;  %v227_v36 = vld [vmem:[#allocation4 + $0x3b8] sm:$0xff] }
 0x110   :  { %v538_v38 = vld [vmem:[#allocation4 + $0xd70] sm:$0xff]  ;;  %1044 = vmatpush.msrb.mxu1 %v474_v37  ;;  %v291_v37 = vld [vmem:[#allocation4 + $0x5b8] sm:$0xff] }
 0x111   :  { %v606_v39 = vld [vmem:[#allocation4 + $0xf90] sm:$0xff]  ;;  %1064 = vmatpush.msrb.mxu2 %v538_v38  ;;  %v359_v38 = vld [vmem:[#allocation4 + $0x7d8] sm:$0xff] }
 0x112   :  { %v406_v12 = vld [vmem:[#allocation4 + $0x950] sm:$0xff]  ;;  %1083 = vmatpush.msrb.mxu3 %v606_v39  ;;  %v2015_v39 = vld [vmem:[%s2067_s0 + $0x28] sm:$0xff] }
 0x113   :  { %v470_v40 = vld [vmem:[#allocation4 + $0xb50] sm:$0xff]  ;;  %1025 = vmatpush.msrb.mxu0 %v406_v12  ;;  %v159_v12 = vld [vmem:[#allocation4 + $0x198] sm:$0xff] }
 0x114   :  { %v534_v41 = vld [vmem:[#allocation4 + $0xd50] sm:$0xff]  ;;  %1045 = vmatpush.msrb.mxu1 %v470_v40  ;;  %v223_v40 = vld [vmem:[#allocation4 + $0x398] sm:$0xff] }
 0x115   :  { %v602_v42 = vld [vmem:[#allocation4 + $0xf70] sm:$0xff]  ;;  %1065 = vmatpush.msrb.mxu2 %v534_v41  ;;  %v287_v41 = vld [vmem:[#allocation4 + $0x598] sm:$0xff] }
 0x116   :  { %v402_v17 = vld [vmem:[#allocation4 + $0x930] sm:$0xff]  ;;  %1084 = vmatpush.msrb.mxu3 %v602_v42  ;;  %v355_v42 = vld [vmem:[#allocation4 + $0x7b8] sm:$0xff] }
 0x117   :  { %v466_v18 = vld [vmem:[#allocation4 + $0xb30] sm:$0xff]  ;;  %1026 = vmatpush.msrb.mxu0 %v402_v17  ;;  %v155_v17 = vld [vmem:[#allocation4 + $0x178] sm:$0xff] }
 0x118   :  { %v530_v43 = vld [vmem:[#allocation4 + $0xd30] sm:$0xff]  ;;  %1046 = vmatpush.msrb.mxu1 %v466_v18  ;;  %v219_v18 = vld [vmem:[#allocation4 + $0x378] sm:$0xff] }
 0x119   :  { %v598_v44 = vld [vmem:[#allocation4 + $0xf50] sm:$0xff]  ;;  %1066 = vmatpush.msrb.mxu2 %v530_v43  ;;  %v283_v43 = vld [vmem:[#allocation4 + $0x578] sm:$0xff] }
 0x11a   :  { %v398_v45 = vld [vmem:[#allocation4 + $0x910] sm:$0xff]  ;;  %1085 = vmatpush.msrb.mxu3 %v598_v44  ;;  %v351_v44 = vld [vmem:[#allocation4 + $0x798] sm:$0xff] }
 0x11b   :  { %v462_v46 = vld [vmem:[#allocation4 + $0xb10] sm:$0xff]  ;;  %1027 = vmatpush.msrb.mxu0 %v398_v45  ;;  %v151_v45 = vld [vmem:[#allocation4 + $0x158] sm:$0xff] }
 0x11c   :  { %v526_v23 = vld [vmem:[#allocation4 + $0xd10] sm:$0xff]  ;;  %1047 = vmatpush.msrb.mxu1 %v462_v46  ;;  %v215_v46 = vld [vmem:[#allocation4 + $0x358] sm:$0xff] }
 0x11d   :  { %v594_v47 = vld [vmem:[#allocation4 + $0xf30] sm:$0xff]  ;;  %1067 = vmatpush.msrb.mxu2 %v526_v23  ;;  %v279_v23 = vld [vmem:[#allocation4 + $0x558] sm:$0xff] }
 0x11e   :  { %v394_v48 = vld [vmem:[#allocation4 + $0x8f0] sm:$0xff]  ;;  %1086 = vmatpush.msrb.mxu3 %v594_v47  ;;  %v347_v47 = vld [vmem:[#allocation4 + $0x778] sm:$0xff] }
 0x11f   :  { %v458_v49 = vld [vmem:[#allocation4 + $0xaf0] sm:$0xff]  ;;  %1028 = vmatpush.msrb.mxu0 %v394_v48  ;;  %v147_v48 = vld [vmem:[#allocation4 + $0x138] sm:$0xff] }
 0x120   :  { %v522_v50 = vld [vmem:[#allocation4 + $0xcf0] sm:$0xff]  ;;  %1048 = vmatpush.msrb.mxu1 %v458_v49  ;;  %v211_v49 = vld [vmem:[#allocation4 + $0x338] sm:$0xff] }
 0x121   :  { %v590_v51 = vld [vmem:[#allocation4 + $0xf10] sm:$0xff]  ;;  %1068 = vmatpush.msrb.mxu2 %v522_v50  ;;  %v275_v50 = vld [vmem:[#allocation4 + $0x538] sm:$0xff] }
 0x122   :  { %v390_v52 = vld [vmem:[#allocation4 + $0x8d0] sm:$0xff]  ;;  %1087 = vmatpush.msrb.mxu3 %v590_v51  ;;  %v343_v51 = vld [vmem:[#allocation4 + $0x758] sm:$0xff] }
 0x123   :  { %v454_v53 = vld [vmem:[#allocation4 + $0xad0] sm:$0xff]  ;;  %1029 = vmatpush.msrb.mxu0 %v390_v52  ;;  %v143_v52 = vld [vmem:[#allocation4 + $0x118] sm:$0xff] }
 0x124   :  { %v518_v54 = vld [vmem:[#allocation4 + $0xcd0] sm:$0xff]  ;;  %1049 = vmatpush.msrb.mxu1 %v454_v53  ;;  %v207_v53 = vld [vmem:[#allocation4 + $0x318] sm:$0xff] }
 0x125   :  { %v586_v55 = vld [vmem:[#allocation4 + $0xef0] sm:$0xff]  ;;  %1069 = vmatpush.msrb.mxu2 %v518_v54  ;;  %v271_v54 = vld [vmem:[#allocation4 + $0x518] sm:$0xff] }
 0x126   :  { %v386_v57 = vld [vmem:[#allocation4 + $0x8b0] sm:$0xff]  ;;  %1088 = vmatpush.msrb.mxu3 %v586_v55  ;;  %v339_v55 = vld [vmem:[#allocation4 + $0x738] sm:$0xff] }
 0x127   :  { %v450_v58 = vld [vmem:[#allocation4 + $0xab0] sm:$0xff]  ;;  %1030 = vmatpush.msrb.mxu0 %v386_v57  ;;  %v139_v57 = vld [vmem:[#allocation4 + $0xf8] sm:$0xff] }
 0x128   :  { %v514_v59 = vld [vmem:[#allocation4 + $0xcb0] sm:$0xff]  ;;  %1050 = vmatpush.msrb.mxu1 %v450_v58  ;;  %v203_v58 = vld [vmem:[#allocation4 + $0x2f8] sm:$0xff] }
 0x129   :  { %v582_v60 = vld [vmem:[#allocation4 + $0xed0] sm:$0xff]  ;;  %1070 = vmatpush.msrb.mxu2 %v514_v59  ;;  %v267_v59 = vld [vmem:[#allocation4 + $0x4f8] sm:$0xff] }
 0x12a   :  { %v382_v63 = vld [vmem:[#allocation4 + $0x890] sm:$0xff]  ;;  %1089 = vmatpush.msrb.mxu3 %v582_v60  ;;  %v335_v60 = vld [vmem:[#allocation4 + $0x718] sm:$0xff] }
 0x12b   :  { %v446_v0 = vld [vmem:[#allocation4 + $0xa90] sm:$0xff]  ;;  %1031 = vmatpush.msrb.mxu0 %v382_v63  ;;  %v135_v63 = vld [vmem:[#allocation4 + $0xd8] sm:$0xff] }
 0x12c   :  { %v510_v1 = vld [vmem:[#allocation4 + $0xc90] sm:$0xff]  ;;  %1051 = vmatpush.msrb.mxu1 %v446_v0  ;;  %v199_v0 = vld [vmem:[#allocation4 + $0x2d8] sm:$0xff] }
 0x12d   :  { %v578_v2 = vld [vmem:[#allocation4 + $0xeb0] sm:$0xff]  ;;  %1071 = vmatpush.msrb.mxu2 %v510_v1  ;;  %v263_v1 = vld [vmem:[#allocation4 + $0x4d8] sm:$0xff] }
 0x12e   :  { %v378_v4 = vld [vmem:[#allocation4 + $0x870] sm:$0xff]  ;;  %1090 = vmatpush.msrb.mxu3 %v578_v2  ;;  %v331_v2 = vld [vmem:[#allocation4 + $0x6f8] sm:$0xff] }
 0x12f   :  { %v442_v5 = vld [vmem:[#allocation4 + $0xa70] sm:$0xff]  ;;  %1032 = vmatpush.msrb.mxu0 %v378_v4  ;;  %v131_v4 = vld [vmem:[#allocation4 + $0xb8] sm:$0xff] }
 0x130   :  { %v506_v6 = vld [vmem:[#allocation4 + $0xc70] sm:$0xff]  ;;  %1052 = vmatpush.msrb.mxu1 %v442_v5  ;;  %v195_v5 = vld [vmem:[#allocation4 + $0x2b8] sm:$0xff] }
 0x131   :  { %v574_v7 = vld [vmem:[#allocation4 + $0xe90] sm:$0xff]  ;;  %1072 = vmatpush.msrb.mxu2 %v506_v6  ;;  %v259_v6 = vld [vmem:[#allocation4 + $0x4b8] sm:$0xff] }
 0x132   :  { %v1973_v8 = vld [vmem:[%s2067_s0 + $0x10] sm:$0xff]  ;;  %1091 = vmatpush.msrb.mxu3 %v574_v7  ;;  %v1985_v15 = vld [vmem:[%s2067_s0 + $0x18] sm:$0xff] }
 0x133   :  { %996 = vmatmul.f32.vlgmr.msra.gmra.mxu2 %v1973_v8  ;;  %v374_v9 = vld [vmem:[#allocation4 + $0x850] sm:$0xff]  ;;  %1016 = vmatmul.f32.vlgmr.msra.gmra.mxu3 %v1985_v15  ;;  %v327_v7 = vld [vmem:[#allocation4 + $0x6d8] sm:$0xff] }
 0x134   :  { %v438_v10 = vld [vmem:[#allocation4 + $0xa50] sm:$0xff]  ;;  %1033 = vmatpush.msrb.mxu0 %v374_v9  ;;  %v127_v9 = vld [vmem:[#allocation4 + $0x98] sm:$0xff] }
 0x135   :  { %v502_v11 = vld [vmem:[#allocation4 + $0xc50] sm:$0xff]  ;;  %1053 = vmatpush.msrb.mxu1 %v438_v10  ;;  %v191_v10 = vld [vmem:[#allocation4 + $0x298] sm:$0xff] }
 0x136   :  { %v570_v14 = vld [vmem:[#allocation4 + $0xe70] sm:$0xff]  ;;  %1073 = vmatpush.msrb.mxu2 %v502_v11  ;;  %v255_v11 = vld [vmem:[#allocation4 + $0x498] sm:$0xff] }
 0x137   :  { %v370_v16 = vld [vmem:[#allocation4 + $0x830] sm:$0xff]  ;;  %1092 = vmatpush.msrb.mxu3 %v570_v14  ;;  %v323_v14 = vld [vmem:[#allocation4 + $0x6b8] sm:$0xff] }
 0x138   :  { %v434_v19 = vld [vmem:[#allocation4 + $0xa30] sm:$0xff]  ;;  %1034 = vmatpush.msrb.mxu0 %v370_v16  ;;  %v123_v16 = vld [vmem:[#allocation4 + $0x78] sm:$0xff] }
 0x139   :  { %v498_v20 = vld [vmem:[#allocation4 + $0xc30] sm:$0xff]  ;;  %1054 = vmatpush.msrb.mxu1 %v434_v19  ;;  %v187_v19 = vld [vmem:[#allocation4 + $0x278] sm:$0xff] }
 0x13a   :  { %v566_v21 = vld [vmem:[#allocation4 + $0xe50] sm:$0xff]  ;;  %1074 = vmatpush.msrb.mxu2 %v498_v20  ;;  %v251_v20 = vld [vmem:[#allocation4 + $0x478] sm:$0xff] }
 0x13b   :  { %v366_v24 = vld [vmem:[#allocation4 + $0x810] sm:$0xff]  ;;  %1093 = vmatpush.msrb.mxu3 %v566_v21  ;;  %v319_v21 = vld [vmem:[#allocation4 + $0x698] sm:$0xff] }
 0x13c   :  { %v430_v25 = vld [vmem:[#allocation4 + $0xa10] sm:$0xff]  ;;  %1035 = vmatpush.msrb.mxu0 %v366_v24  ;;  %v119_v24 = vld [vmem:[#allocation4 + $0x58] sm:$0xff] }
 0x13d   :  { %v494_v26 = vld [vmem:[#allocation4 + $0xc10] sm:$0xff]  ;;  %1055 = vmatpush.msrb.mxu1 %v430_v25  ;;  %1036 = vmatmul.f32.vlgmr.msrb.gmra.mxu0 %v2003_v3  ;;  %v183_v25 = vld [vmem:[#allocation4 + $0x258] sm:$0xff] }
 0x13e   :  { %v562_v27 = vld [vmem:[#allocation4 + $0xe30] sm:$0xff]  ;;  %1075 = vmatpush.msrb.mxu2 %v494_v26  ;;  %1100 = vmatpush.msra.mxu0 %v171_v56  ;;  %v247_v26 = vld [vmem:[#allocation4 + $0x458] sm:$0xff] }
 0x13f   :  { %1094 = vmatpush.msrb.mxu3 %v562_v27  ;;  %v558_v30 = vld [vmem:[#allocation4 + $0xe10] sm:$0xff]  ;;  %1120 = vmatpush.msra.mxu1 %v235_v28  ;;  %v315_v27 = vld [vmem:[#allocation4 + $0x678] sm:$0xff] }
 0x140   :  { %v1997_v61 = vld [vmem:[%s2067_s0 + $0x30] sm:$0xff]  ;;  %1140 = vmatpush.msra.mxu2 %v299_v29  ;;  %v2009_v34 = vld [vmem:[%s2067_s0 + $0x38] sm:$0xff]  ;;  %1101 = vmatpush.msra.mxu0 %v167_v62 }
 0x141   :  { %1076 = vmatmul.f32.vlgmr.msrb.gmra.mxu2 %v1997_v61  ;;  %1095 = vmatpush.msrb.mxu3 %v558_v30  ;;  %v115_v56 = vld [vmem:[#allocation4 + $0x38] sm:$0xff] }
 0x142   :  { %1096 = vmatmul.f32.vlgmr.msrb.gmra.mxu3 %v2009_v34  ;;  %1121 = vmatpush.msra.mxu1 %v231_v31  ;;  %v179_v28 = vld [vmem:[#allocation4 + $0x238] sm:$0xff] }
 0x143   :  { %1141 = vmatpush.msra.mxu2 %v295_v32  ;;  %1160 = vmatpush.msra.mxu3 %v363_v33  ;;  %v243_v29 = vld [vmem:[#allocation4 + $0x438] sm:$0xff] }
 0x144   :  { %1056 = vmatmul.f32.vlgmr.msrb.gmra.mxu1 %v2015_v39  ;;  %1102 = vmatpush.msra.mxu0 %v163_v35  ;;  %v311_v30 = vld [vmem:[#allocation4 + $0x658] sm:$0xff] }
 0x145   :  { %1122 = vmatpush.msra.mxu1 %v227_v36  ;;  %1142 = vmatpush.msra.mxu2 %v291_v37  ;;  %v111_v62 = vld [vmem:[#allocation4 + $0x18] sm:$0xff] }
 0x146   :  { %1161 = vmatpush.msra.mxu3 %v359_v38  ;;  %1103 = vmatpush.msra.mxu0 %v159_v12  ;;  %v175_v31 = vld [vmem:[#allocation4 + $0x218] sm:$0xff] }
 0x147   :  { %1123 = vmatpush.msra.mxu1 %v223_v40  ;;  %1143 = vmatpush.msra.mxu2 %v287_v41  ;;  %v239_v32 = vld [vmem:[#allocation4 + $0x418] sm:$0xff] }
 0x148   :  { %1162 = vmatpush.msra.mxu3 %v355_v42  ;;  %1104 = vmatpush.msra.mxu0 %v155_v17  ;;  %v307_v33 = vld [vmem:[#allocation4 + $0x638] sm:$0xff] }
 0x149   :  { %1124 = vmatpush.msra.mxu1 %v219_v18  ;;  %1144 = vmatpush.msra.mxu2 %v283_v43  ;;  %v427_v35 = vld [vmem:[#allocation4 + $0x9f8] sm:$0xff] }
 0x14a   :  { %1163 = vmatpush.msra.mxu3 %v351_v44  ;;  %1105 = vmatpush.msra.mxu0 %v151_v45  ;;  %v491_v36 = vld [vmem:[#allocation4 + $0xbf8] sm:$0xff] }
 0x14b   :  { %1125 = vmatpush.msra.mxu1 %v215_v46  ;;  %1145 = vmatpush.msra.mxu2 %v279_v23  ;;  %v555_v37 = vld [vmem:[#allocation4 + $0xdf8] sm:$0xff] }
 0x14c   :  { %1164 = vmatpush.msra.mxu3 %v347_v47  ;;  %1106 = vmatpush.msra.mxu0 %v147_v48  ;;  %v303_v38 = vld [vmem:[#allocation4 + $0x618] sm:$0xff] }
 0x14d   :  { %1126 = vmatpush.msra.mxu1 %v211_v49  ;;  %1146 = vmatpush.msra.mxu2 %v275_v50  ;;  %v423_v12 = vld [vmem:[#allocation4 + $0x9d8] sm:$0xff] }
 0x14e   :  { %1165 = vmatpush.msra.mxu3 %v343_v51  ;;  %1107 = vmatpush.msra.mxu0 %v143_v52  ;;  %v487_v40 = vld [vmem:[#allocation4 + $0xbd8] sm:$0xff] }
 0x14f   :  { %1127 = vmatpush.msra.mxu1 %v207_v53  ;;  %1147 = vmatpush.msra.mxu2 %v271_v54  ;;  %v551_v41 = vld [vmem:[#allocation4 + $0xdd8] sm:$0xff] }
 0x150   :  { %1166 = vmatpush.msra.mxu3 %v339_v55  ;;  %1108 = vmatpush.msra.mxu0 %v139_v57  ;;  %v619_v42 = vld [vmem:[#allocation4 + $0xff8] sm:$0xff]  ;;  %v2018_v57 = vpop.f32.mrf.mxu1 }
 0x151   :  { %1128 = vmatpush.msra.mxu1 %v203_v58  ;;  %1148 = vmatpush.msra.mxu2 %v267_v59  ;;  %v419_v17 = vld [vmem:[#allocation4 + $0x9b8] sm:$0xff] }
 0x152   :  { %1167 = vmatpush.msra.mxu3 %v335_v60  ;;  %1109 = vmatpush.msra.mxu0 %v135_v63  ;;  %v483_v18 = vld [vmem:[#allocation4 + $0xbb8] sm:$0xff] }
 0x153   :  { %1129 = vmatpush.msra.mxu1 %v199_v0  ;;  %1149 = vmatpush.msra.mxu2 %v263_v1  ;;  %v547_v43 = vld [vmem:[#allocation4 + $0xdb8] sm:$0xff]  ;;  %v2020_v0 = vpop.f32.mrf.mxu0 }
 0x154   :  { %1168 = vmatpush.msra.mxu3 %v331_v2  ;;  %1110 = vmatpush.msra.mxu0 %v131_v4  ;;  %v615_v44 = vld [vmem:[#allocation4 + $0xfd8] sm:$0xff] }
 0x155   :  { %1130 = vmatpush.msra.mxu1 %v195_v5  ;;  %1150 = vmatpush.msra.mxu2 %v259_v6  ;;  %v415_v45 = vld [vmem:[#allocation4 + $0x998] sm:$0xff]  ;;  %v2022_v6 = vpop.f32.mrf.mxu2 }
 0x156   :  { %1169 = vmatpush.msra.mxu3 %v327_v7  ;;  %1111 = vmatpush.msra.mxu0 %v127_v9  ;;  %v479_v46 = vld [vmem:[#allocation4 + $0xb98] sm:$0xff] }
 0x157   :  { %1131 = vmatpush.msra.mxu1 %v191_v10  ;;  %1151 = vmatpush.msra.mxu2 %v255_v11  ;;  %v543_v23 = vld [vmem:[#allocation4 + $0xd98] sm:$0xff] }
 0x158   :  { %1170 = vmatpush.msra.mxu3 %v323_v14  ;;  %1112 = vmatpush.msra.mxu0 %v123_v16  ;;  %v611_v47 = vld [vmem:[#allocation4 + $0xfb8] sm:$0xff] }
 0x159   :  { %1132 = vmatpush.msra.mxu1 %v187_v19  ;;  %1152 = vmatpush.msra.mxu2 %v251_v20  ;;  %v411_v48 = vld [vmem:[#allocation4 + $0x978] sm:$0xff] }
 0x15a   :  { %1171 = vmatpush.msra.mxu3 %v319_v21  ;;  %1113 = vmatpush.msra.mxu0 %v119_v24  ;;  %v475_v49 = vld [vmem:[#allocation4 + $0xb78] sm:$0xff]  ;;  %v2024_v21 = vpop.f32.mrf.mxu3 }
 0x15b   :  { %1133 = vmatpush.msra.mxu1 %v183_v25  ;;  %1153 = vmatpush.msra.mxu2 %v247_v26  ;;  %v539_v50 = vld [vmem:[#allocation4 + $0xd78] sm:$0xff] }
 0x15c   :  { %1172 = vmatpush.msra.mxu3 %v315_v27  ;;  %1114 = vmatpush.msra.mxu0 %v115_v56  ;;  %v607_v51 = vld [vmem:[#allocation4 + $0xf98] sm:$0xff]  ;;  %v2026_v56 = vpop.f32.mrf.mxu1 }
 0x15d   :  { %1134 = vmatpush.msra.mxu1 %v179_v28  ;;  %1154 = vmatpush.msra.mxu2 %v243_v29  ;;  %v407_v52 = vld [vmem:[#allocation4 + $0x958] sm:$0xff] }
 0x15e   :  { %1173 = vmatpush.msra.mxu3 %v311_v30  ;;  %1115 = vmatpush.msra.mxu0 %v111_v62  ;;  %v471_v53 = vld [vmem:[#allocation4 + $0xb58] sm:$0xff]  ;;  %v2028_v62 = vpop.f32.mrf.mxu0 }
 0x15f   :  { %1135 = vmatpush.msra.mxu1 %v175_v31  ;;  %1155 = vmatpush.msra.mxu2 %v239_v32  ;;  %v535_v54 = vld [vmem:[#allocation4 + $0xd58] sm:$0xff] }
 0x160   :  { %1174 = vmatpush.msra.mxu3 %v307_v33  ;;  %1180 = vmatpush.msrb.mxu0 %v427_v35  ;;  %v603_v55 = vld [vmem:[#allocation4 + $0xf78] sm:$0xff]  ;;  %v2031_v33 = vpop.f32.mrf.mxu2 }
 0x161   :  { %1200 = vmatpush.msrb.mxu1 %v491_v36  ;;  %1220 = vmatpush.msrb.mxu2 %v555_v37  ;;  %v403_v58 = vld [vmem:[#allocation4 + $0x938] sm:$0xff] }
 0x162   :  { %1175 = vmatpush.msra.mxu3 %v303_v38  ;;  %1181 = vmatpush.msrb.mxu0 %v423_v12  ;;  %v467_v59 = vld [vmem:[#allocation4 + $0xb38] sm:$0xff] }
 0x163   :  { %1201 = vmatpush.msrb.mxu1 %v487_v40  ;;  %1221 = vmatpush.msrb.mxu2 %v551_v41  ;;  %v531_v60 = vld [vmem:[#allocation4 + $0xd38] sm:$0xff]  ;;  %v2035_v41 = vpop.f32.mrf.mxu3 }
 0x164   :  { %1240 = vmatpush.msrb.mxu3 %v619_v42  ;;  %1182 = vmatpush.msrb.mxu0 %v419_v17  ;;  %v599_v63 = vld [vmem:[#allocation4 + $0xf58] sm:$0xff] }
 0x165   :  { %1202 = vmatpush.msrb.mxu1 %v483_v18  ;;  %1222 = vmatpush.msrb.mxu2 %v547_v43  ;;  %v399_v1 = vld [vmem:[#allocation4 + $0x918] sm:$0xff]  ;;  %v817_v18 = vpop.f32.mrf.mxu1 }
 0x166   :  { %1241 = vmatpush.msrb.mxu3 %v615_v44  ;;  %1183 = vmatpush.msrb.mxu0 %v415_v45  ;;  %v463_v2 = vld [vmem:[#allocation4 + $0xb18] sm:$0xff]  ;;  %v797_v44 = vpop.f32.mrf.mxu0 }
 0x167   :  { %1203 = vmatpush.msrb.mxu1 %v479_v46  ;;  %1223 = vmatpush.msrb.mxu2 %v543_v23  ;;  %v527_v4 = vld [vmem:[#allocation4 + $0xd18] sm:$0xff] }
 0x168   :  { %1242 = vmatpush.msrb.mxu3 %v611_v47  ;;  %1184 = vmatpush.msrb.mxu0 %v411_v48  ;;  %v595_v5 = vld [vmem:[#allocation4 + $0xf38] sm:$0xff]  ;;  %v837_v48 = vpop.f32.mrf.mxu2 }
 0x169   :  { %1204 = vmatpush.msrb.mxu1 %v475_v49  ;;  %1224 = vmatpush.msrb.mxu2 %v539_v50  ;;  %v395_v7 = vld [vmem:[#allocation4 + $0x8f8] sm:$0xff] }
 0x16a   :  { %1243 = vmatpush.msrb.mxu3 %v607_v51  ;;  %1185 = vmatpush.msrb.mxu0 %v407_v52  ;;  %v459_v9 = vld [vmem:[#allocation4 + $0xaf8] sm:$0xff] }
 0x16b   :  { %1205 = vmatpush.msrb.mxu1 %v471_v53  ;;  %1225 = vmatpush.msrb.mxu2 %v535_v54  ;;  %v523_v10 = vld [vmem:[#allocation4 + $0xcf8] sm:$0xff]  ;;  %v1345_v53 = vld [vmem:[#allocation8 + $0xe0] sm:$0xff] }
 0x16c   :  { %1244 = vmatpush.msrb.mxu3 %v603_v55  ;;  %1186 = vmatpush.msrb.mxu0 %v403_v58  ;;  %v591_v11 = vld [vmem:[#allocation4 + $0xf18] sm:$0xff]  ;;  %v1377_v55 = vld [vmem:[#allocation8 + $0x1e0] sm:$0xff] }
 0x16d   :  { %1206 = vmatpush.msrb.mxu1 %v467_v59  ;;  %1226 = vmatpush.msrb.mxu2 %v531_v60  ;;  %v391_v14 = vld [vmem:[#allocation4 + $0x8d8] sm:$0xff] }
 0x16e   :  { %1245 = vmatpush.msrb.mxu3 %v599_v63  ;;  %1187 = vmatpush.msrb.mxu0 %v399_v1  ;;  %v455_v16 = vld [vmem:[#allocation4 + $0xad8] sm:$0xff]  ;;  %v1373_v1 = vld [vmem:[#allocation8 + $0x1c0] sm:$0xff] }
 0x16f   :  { %1207 = vmatpush.msrb.mxu1 %v463_v2  ;;  %1227 = vmatpush.msrb.mxu2 %v527_v4  ;;  %v519_v19 = vld [vmem:[#allocation4 + $0xcd8] sm:$0xff]  ;;  %v877_v2 = vpop.f32.mrf.mxu0 }
 0x170   :  { %1246 = vmatpush.msrb.mxu3 %v595_v5  ;;  %1188 = vmatpush.msrb.mxu0 %v395_v7  ;;  %v587_v20 = vld [vmem:[#allocation4 + $0xef8] sm:$0xff]  ;;  %v1405_v7 = vld [vmem:[#allocation8 + $0x2c0] sm:$0xff] }
 0x171   :  { %1208 = vmatpush.msrb.mxu1 %v459_v9  ;;  %1228 = vmatpush.msrb.mxu2 %v523_v10  ;;  %v387_v24 = vld [vmem:[#allocation4 + $0x8b8] sm:$0xff]  ;;  %v1337_v9 = vld [vmem:[#allocation8 + $0xa0] sm:$0xff]  ;;  %v897_v10 = vpop.f32.mrf.mxu1 }
 0x172   :  { %1247 = vmatpush.msrb.mxu3 %v591_v11  ;;  %v451_v25 = vld [vmem:[#allocation4 + $0xab8] sm:$0xff]  ;;  %1189 = vmatpush.msrb.mxu0 %v391_v14  ;;  %v1369_v11 = vld [vmem:[#allocation8 + $0x1a0] sm:$0xff] }
 0x173   :  { %1209 = vmatpush.msrb.mxu1 %v455_v16  ;;  %v515_v26 = vld [vmem:[#allocation4 + $0xcb8] sm:$0xff]  ;;  %1229 = vmatpush.msrb.mxu2 %v519_v19 }
 0x174   :  { %v583_v27 = vld [vmem:[#allocation4 + $0xed8] sm:$0xff]  ;;  %1248 = vmatpush.msrb.mxu3 %v587_v20  ;;  %1190 = vmatpush.msrb.mxu0 %v387_v24 }
 0x175   :  { %v383_v28 = vld [vmem:[#allocation4 + $0x898] sm:$0xff]  ;;  %1210 = vmatpush.msrb.mxu1 %v451_v25  ;;  %1230 = vmatpush.msrb.mxu2 %v515_v26  ;;  %v1333_v25 = vld [vmem:[#allocation8 + $0x80] sm:$0xff]  ;;  %v917_v26 = vpop.f32.mrf.mxu2 }
 0x176   :  { %v447_v29 = vld [vmem:[#allocation4 + $0xa98] sm:$0xff]  ;;  %1249 = vmatpush.msrb.mxu3 %v583_v27  ;;  %1156 = vmatmul.f32.vlgmr.msra.gmra.mxu2 %v1973_v8  ;;  %v1365_v27 = vld [vmem:[#allocation8 + $0x180] sm:$0xff] }
 0x177   :  { %v511_v30 = vld [vmem:[#allocation4 + $0xc98] sm:$0xff]  ;;  %1191 = vmatpush.msrb.mxu0 %v383_v28  ;;  %1211 = vmatpush.msrb.mxu1 %v447_v29 }
 0x178   :  { %v579_v31 = vld [vmem:[#allocation4 + $0xeb8] sm:$0xff]  ;;  %1231 = vmatpush.msrb.mxu2 %v511_v30  ;;  %1116 = vmatmul.f32.vlgmr.msra.gmra.mxu0 %v1979_v13 }
 0x179   :  { %v379_v32 = vld [vmem:[#allocation4 + $0x878] sm:$0xff]  ;;  %1250 = vmatpush.msrb.mxu3 %v579_v31  ;;  %1136 = vmatmul.f32.vlgmr.msra.gmra.mxu1 %v1991_v22  ;;  %v818_v22 = vadd.f32 %v817_v18, %v797_v44  ;;  %v1397_v31 = vld [vmem:[#allocation8 + $0x280] sm:$0xff] }
 0x17a   :  { %v443_v35 = vld [vmem:[#allocation4 + $0xa78] sm:$0xff]  ;;  %1176 = vmatmul.f32.vlgmr.msra.gmra.mxu3 %v1985_v15  ;;  %1192 = vmatpush.msrb.mxu0 %v379_v32  ;;  %v658_v15 = vadd.f32 %v2018_v57, %v2020_v0  ;;  %v857_v57 = vpop.f32.mrf.mxu3  ;;  %v1341_v0 = vld [vmem:[#allocation8 + $0xc0] sm:$0xff] }
 0x17b   :  { %v507_v36 = vld [vmem:[#allocation4 + $0xc78] sm:$0xff]  ;;  %1212 = vmatpush.msrb.mxu1 %v443_v35  ;;  %v838_v54 = vadd.f32 %v837_v48, %v818_v22  ;;  %v1329_v35 = vld [vmem:[#allocation8 + $0x60] sm:$0xff] }
 0x17c   :  { %v575_v37 = vld [vmem:[#allocation4 + $0xe98] sm:$0xff]  ;;  %1232 = vmatpush.msrb.mxu2 %v507_v36  ;;  %v678_v51 = vadd.f32 %v2022_v6, %v658_v15  ;;  %v1353_v22 = vld [vmem:[#allocation8 + $0x120] sm:$0xff] }
 0x17d   :  { %v375_v38 = vld [vmem:[#allocation4 + $0x858] sm:$0xff]  ;;  %1251 = vmatpush.msrb.mxu3 %v575_v37  ;;  %v1361_v37 = vld [vmem:[#allocation8 + $0x160] sm:$0xff] }
 0x17e   :  { %v439_v12 = vld [vmem:[#allocation4 + $0xa58] sm:$0xff]  ;;  %1193 = vmatpush.msrb.mxu0 %v375_v38  ;;  %v698_v60 = vadd.f32 %v2024_v21, %v678_v51  ;;  %v1401_v21 = vld [vmem:[#allocation8 + $0x2a0] sm:$0xff] }
 0x17f   :  { %v503_v8 = vld [vmem:[#allocation4 + $0xc58] sm:$0xff]  ;;  %1213 = vmatpush.msrb.mxu1 %v439_v12 }
 0x180   :  { %v571_v40 = vld [vmem:[#allocation4 + $0xe78] sm:$0xff]  ;;  %1233 = vmatpush.msrb.mxu2 %v503_v8 }
 0x181   :  { %v371_v42 = vld [vmem:[#allocation4 + $0x838] sm:$0xff]  ;;  %1252 = vmatpush.msrb.mxu3 %v571_v40 }
 0x182   :  { %v435_v17 = vld [vmem:[#allocation4 + $0xa38] sm:$0xff]  ;;  %1194 = vmatpush.msrb.mxu0 %v371_v42  ;;  %v937_v36 = vpop.f32.mrf.mxu3  ;;  %v1393_v42 = vld [vmem:[#allocation8 + $0x260] sm:$0xff] }
 0x183   :  { %v499_v13 = vld [vmem:[#allocation4 + $0xc38] sm:$0xff]  ;;  %1214 = vmatpush.msrb.mxu1 %v435_v17 }
 0x184   :  { %v567_v43 = vld [vmem:[#allocation4 + $0xe58] sm:$0xff]  ;;  %1234 = vmatpush.msrb.mxu2 %v499_v13  ;;  %v1325_v13 = vld [vmem:[#allocation8 + $0x40] sm:$0xff] }
 0x185   :  { %v367_v45 = vld [vmem:[#allocation4 + $0x818] sm:$0xff]  ;;  %1253 = vmatpush.msrb.mxu3 %v567_v43  ;;  %v1357_v43 = vld [vmem:[#allocation8 + $0x140] sm:$0xff] }
 0x186   :  { %v431_v46 = vld [vmem:[#allocation4 + $0xa18] sm:$0xff]  ;;  %1195 = vmatpush.msrb.mxu0 %v367_v45 }
 0x187   :  { %v495_v23 = vld [vmem:[#allocation4 + $0xc18] sm:$0xff]  ;;  %1215 = vmatpush.msrb.mxu1 %v431_v46  ;;  %1196 = vmatmul.f32.vlgmr.msrb.gmra.mxu0 %v2003_v3  ;;  %v1409_v3 = vld [vmem:[#allocation8 + $0x2e0] sm:$0xff] }
 0x188   :  { %v563_v47 = vld [vmem:[#allocation4 + $0xe38] sm:$0xff]  ;;  %1235 = vmatpush.msrb.mxu2 %v495_v23  ;;  %1216 = vmatmul.f32.vlgmr.msrb.gmra.mxu1 %v2015_v39  ;;  %v718_v39 = vadd.f32 %v2028_v62, %v698_v60  ;;  %v1389_v46 = vld [vmem:[#allocation8 + $0x240] sm:$0xff] }
 0x189   :  { %v1347_v49 = vld [vmem:[#allocation8 + $0xf0] sm:$0xff]  ;;  %1254 = vmatpush.msrb.mxu3 %v563_v47  ;;  %1236 = vmatmul.f32.vlgmr.msrb.gmra.mxu2 %v1997_v61  ;;  %v858_v61 = vadd.f32 %v857_v57, %v838_v54  ;;  %v1321_v47 = vld [vmem:[#allocation8 + $0x20] sm:$0xff]  ;;  %v1348_v57 = vld [vmem:[#allocation8 + $0xf8] sm:$0xff] }
 0x18a   :  { %v1379_v50 = vld [vmem:[#allocation8 + $0x1f0] sm:$0xff]  ;;  %1451 = vmatpush.msra.mxu0 %v1347_v49  ;;  %v738_v19 = vadd.f32 %v2026_v56, %v718_v39  ;;  %v2049_v56 = vld [vmem:[#allocation6] sm:$0xf]  ;;  %v1317_v54 = vld [vmem:[#allocation8] sm:$0xff] }
 0x18b   :  { %v559_v52 = vld [vmem:[#allocation4 + $0xe18] sm:$0xff]  ;;  %1471 = vmatpush.msra.mxu1 %v1379_v50  ;;  %v1294_v18 = vperm.slane %v2049_v56, 1  ;;  %v1410_v39 = vld [vmem:[#allocation8 + $0x2e8] sm:$0xff] }
 0x18c   :  { %v1411_v58 = vld [vmem:[#allocation8 + $0x2f0] sm:$0xff]  ;;  %1255 = vmatpush.msrb.mxu3 %v559_v52  ;;  %1452 = vmatpush.msra.mxu0 %v1345_v53  ;;  %v758_v30 = vadd.f32 %v2031_v33, %v738_v19  ;;  %v1293_v33 = vperm.slane %v2049_v56, 0  ;;  %v1385_v52 = vld [vmem:[#allocation8 + $0x220] sm:$0xff]  ;;  %v1404_v19 = vld [vmem:[#allocation8 + $0x2b8] sm:$0xff] }
 0x18d   :  { %v1343_v59 = vld [vmem:[#allocation8 + $0xd0] sm:$0xff]  ;;  %1256 = vmatmul.f32.vlgmr.msrb.gmra.mxu3 %v2009_v34  ;;  %1472 = vmatpush.msra.mxu1 %v1377_v55  ;;  %v878_v34 = vadd.f32 %v877_v2, %v858_v61  ;;  %v1349_v55 = vld [vmem:[#allocation8 + $0x100] sm:$0xff]  ;;  %v1378_v61 = vld [vmem:[#allocation8 + $0x1e8] sm:$0xff] }
 0x18e   :  { %v1375_v63 = vld [vmem:[#allocation8 + $0x1d0] sm:$0xff]  ;;  %1491 = vmatpush.msra.mxu2 %v1411_v58  ;;  %1453 = vmatpush.msra.mxu0 %v1343_v59  ;;  %v778_v8 = vadd.f32 %v2035_v41, %v758_v30  ;;  %v1380_v59 = vld [vmem:[#allocation8 + $0x1f8] sm:$0xff]  ;;  %v1330_v30 = vld [vmem:[#allocation8 + $0x68] sm:$0xff] }
 0x18f   :  { %v1407_v4 = vld [vmem:[#allocation8 + $0x2d0] sm:$0xff]  ;;  %1473 = vmatpush.msra.mxu1 %v1375_v63  ;;  %v898_v24 = vadd.f32 %v897_v10, %v878_v34  ;;  %v1412_v2 = vld [vmem:[#allocation8 + $0x2f8] sm:$0xff]  ;;  %v1338_v10 = vld [vmem:[#allocation8 + $0xa8] sm:$0xff] }
 0x190   :  { %v1339_v5 = vld [vmem:[#allocation8 + $0xb0] sm:$0xff]  ;;  %1492 = vmatpush.msra.mxu2 %v1409_v3  ;;  %1454 = vmatpush.msra.mxu0 %v1341_v0  ;;  %v1301_v45 = vadd.f32 %v1293_v33, %v778_v8  ;;  %v1346_v3 = vld [vmem:[#allocation8 + $0xe8] sm:$0xff]  ;;  %v1381_v0 = vld [vmem:[#allocation8 + $0x200] sm:$0xff]  ;;  %v977_v33 = vpop.f32.mrf.mxu1 }
 0x191   :  { %v1371_v6 = vld [vmem:[#allocation8 + $0x1b0] sm:$0xff]  ;;  %1474 = vmatpush.msra.mxu1 %v1373_v1  ;;  %v918_v32 = vadd.f32 %v917_v26, %v898_v24  ;;  %v1344_v1 = vld [vmem:[#allocation8 + $0xd8] sm:$0xff]  ;;  %v1334_v24 = vld [vmem:[#allocation8 + $0x88] sm:$0xff] }
 0x192   :  { %1493 = vmatpush.msra.mxu2 %v1407_v4  ;;  %1455 = vmatpush.msra.mxu0 %v1339_v5  ;;  %v1403_v14 = vld [vmem:[#allocation8 + $0x2b0] sm:$0xff]  ;;  %v1309_v50 = vmul.f32 0.2, %v1301_v45  ;;  %vm1305_vm0 = vcmp.gt.f32.partialorder %v1301_v45, 0.0  ;;  %v1376_v4 = vld [vmem:[#allocation8 + $0x1d8] sm:$0xff]  ;;  %v1342_v5 = vld [vmem:[#allocation8 + $0xc8] sm:$0xff] }
 0x193   :  { %1475 = vmatpush.msra.mxu1 %v1371_v6  ;;  %v1335_v16 = vld [vmem:[#allocation8 + $0x90] sm:$0xff]  ;;  %v938_v17 = vadd.f32 %v937_v36, %v918_v32  ;;  %v1374_v6 = vld [vmem:[#allocation8 + $0x1c8] sm:$0xff]  ;;  %v1408_v34 = vld [vmem:[#allocation8 + $0x2d8] sm:$0xff]  ;;  %v957_v32 = vpop.f32.mrf.mxu0 }
 0x194   :  { %1494 = vmatpush.msra.mxu2 %v1405_v7  ;;  %1456 = vmatpush.msra.mxu0 %v1337_v9  ;;  %v1367_v20 = vld [vmem:[#allocation8 + $0x190] sm:$0xff]  ;;  %v2054_v58 = vsel %vm1305_vm0, %v1301_v45, %v1309_v50  ;;  %v1340_v7 = vld [vmem:[#allocation8 + $0xb8] sm:$0xff]  ;;  %v1366_v26 = vld [vmem:[#allocation8 + $0x188] sm:$0xff] }
 0x195   :  { %1476 = vmatpush.msra.mxu1 %v1369_v11  ;;  %v1399_v28 = vld [vmem:[#allocation8 + $0x290] sm:$0xff]  ;;  %v1302_v23 = vadd.f32 %v1294_v18, %v938_v17  ;;  %v1372_v9 = vld [vmem:[#allocation8 + $0x1b8] sm:$0xff]  ;;  %v1406_v11 = vld [vmem:[#allocation8 + $0x2c8] sm:$0xff]  ;;  %v978_v17 = vadd.f32 %v977_v33, %v957_v32 }
 0x196   :  { %1495 = vmatpush.msra.mxu2 %v1403_v14  ;;  %1457 = vmatpush.msra.mxu0 %v1335_v16  ;;  %v1331_v29 = vld [vmem:[#allocation8 + $0x70] sm:$0xff]  ;;  %v1370_v14 = vld [vmem:[#allocation8 + $0x1a8] sm:$0xff]  ;;  %v1336_v16 = vld [vmem:[#allocation8 + $0x98] sm:$0xff] }
 0x197   :  { %1477 = vmatpush.msra.mxu1 %v1367_v20  ;;  %v1363_v62 = vld [vmem:[#allocation8 + $0x170] sm:$0xff]  ;;  %v1310_v53 = vmul.f32 0.2, %v1302_v23  ;;  %vm1306_vm1 = vcmp.gt.f32.partialorder %v1302_v23, 0.0  ;;  %v1368_v20 = vld [vmem:[#allocation8 + $0x198] sm:$0xff]  ;;  %v1326_v8 = vld [vmem:[#allocation8 + $0x48] sm:$0xff] }
 0x198   :  { %1496 = vmatpush.msra.mxu2 %v1401_v21  ;;  %1458 = vmatpush.msra.mxu0 %v1333_v25  ;;  %v1395_v38 = vld [vmem:[#allocation8 + $0x270] sm:$0xff]  ;;  %v1402_v25 = vld [vmem:[#allocation8 + $0x2a8] sm:$0xff]  ;;  %v1396_v36 = vld [vmem:[#allocation8 + $0x278] sm:$0xff] }
 0x199   :  { %1478 = vmatpush.msra.mxu1 %v1365_v27  ;;  %v1327_v12 = vld [vmem:[#allocation8 + $0x50] sm:$0xff]  ;;  %v2057_v63 = vsel %vm1306_vm1, %v1302_v23, %v1310_v53  ;;  %v1332_v27 = vld [vmem:[#allocation8 + $0x78] sm:$0xff]  ;;  %v1426_v32 = vld [vmem:[#allocation8 + $0x368] sm:$0xff] }
 0x19a   :  { %1497 = vmatpush.msra.mxu2 %v1399_v28  ;;  %1459 = vmatpush.msra.mxu0 %v1331_v29  ;;  %v1359_v40 = vld [vmem:[#allocation8 + $0x150] sm:$0xff]  ;;  %v1400_v28 = vld [vmem:[#allocation8 + $0x298] sm:$0xff]  ;;  %v1414_v33 = vld [vmem:[#allocation8 + $0x308] sm:$0xff] }
 0x19b   :  { %1479 = vmatpush.msra.mxu1 %v1363_v62  ;;  %v1391_v15 = vld [vmem:[#allocation8 + $0x250] sm:$0xff]  ;;  %v1364_v29 = vld [vmem:[#allocation8 + $0x178] sm:$0xff]  ;;  %v1398_v62 = vld [vmem:[#allocation8 + $0x288] sm:$0xff] }
 0x19c   :  { %1498 = vmatpush.msra.mxu2 %v1397_v31  ;;  %1460 = vmatpush.msra.mxu0 %v1329_v35  ;;  %v1323_v44 = vld [vmem:[#allocation8 + $0x30] sm:$0xff]  ;;  %v1362_v31 = vld [vmem:[#allocation8 + $0x168] sm:$0xff]  ;;  %v1328_v35 = vld [vmem:[#allocation8 + $0x58] sm:$0xff] }
 0x19d   :  { %1480 = vmatpush.msra.mxu1 %v1361_v37  ;;  %v1355_v41 = vld [vmem:[#allocation8 + $0x130] sm:$0xff]  ;;  %v1441_v37 = vld [vmem:[#allocation8 + $0x3e0] sm:$0xff]  ;;  %v1320_v50 = vld [vmem:[#allocation8 + $0x18] sm:$0xff] }
 0x19e   :  { %1499 = vmatpush.msra.mxu2 %v1395_v38  ;;  %1461 = vmatpush.msra.mxu0 %v1327_v12  ;;  %v1387_v48 = vld [vmem:[#allocation8 + $0x230] sm:$0xff]  ;;  %v1360_v38 = vld [vmem:[#allocation8 + $0x158] sm:$0xff] }
 0x19f   :  { %1481 = vmatpush.msra.mxu1 %v1359_v40  ;;  %v1319_v49 = vld [vmem:[#allocation8 + $0x10] sm:$0xff]  ;;  %v1394_v40 = vld [vmem:[#allocation8 + $0x268] sm:$0xff] }
 0x1a0   :  { %1500 = vmatpush.msra.mxu2 %v1393_v42  ;;  %1462 = vmatpush.msra.mxu0 %v1325_v13  ;;  %v1351_v51 = vld [vmem:[#allocation8 + $0x110] sm:$0xff]  ;;  %v1358_v42 = vld [vmem:[#allocation8 + $0x148] sm:$0xff]  ;;  %v1437_v13 = vld [vmem:[#allocation8 + $0x3c0] sm:$0xff] }
 0x1a1   :  { %1482 = vmatpush.msra.mxu1 %v1357_v43  ;;  %v1383_v60 = vld [vmem:[#allocation8 + $0x210] sm:$0xff]  ;;  %v1324_v43 = vld [vmem:[#allocation8 + $0x38] sm:$0xff] }
 0x1a2   :  { %1501 = vmatpush.msra.mxu2 %v1391_v15  ;;  %1463 = vmatpush.msra.mxu0 %v1323_v44  ;;  %v1443_v21 = vld [vmem:[#allocation8 + $0x3f0] sm:$0xff]  ;;  %v1392_v15 = vld [vmem:[#allocation8 + $0x258] sm:$0xff] }
 0x1a3   :  { %1483 = vmatpush.msra.mxu1 %v1355_v41  ;;  %1511 = vmatpush.msra.mxu3 %v1443_v21  ;;  %v1439_v12 = vld [vmem:[#allocation8 + $0x3d0] sm:$0xff]  ;;  %v1356_v44 = vld [vmem:[#allocation8 + $0x138] sm:$0xff]  ;;  %v1413_v21 = vld [vmem:[#allocation8 + $0x300] sm:$0xff] }
 0x1a4   :  { %1502 = vmatpush.msra.mxu2 %v1389_v46  ;;  %1464 = vmatpush.msra.mxu0 %v1321_v47  ;;  %v1435_v41 = vld [vmem:[#allocation8 + $0x3b0] sm:$0xff]  ;;  %v1322_v46 = vld [vmem:[#allocation8 + $0x28] sm:$0xff] }
 0x1a5   :  { %1484 = vmatpush.msra.mxu1 %v1353_v22  ;;  %1512 = vmatpush.msra.mxu3 %v1441_v37  ;;  %v1390_v47 = vld [vmem:[#allocation8 + $0x248] sm:$0xff]  ;;  %v1420_v37 = vld [vmem:[#allocation8 + $0x338] sm:$0xff] }
 0x1a6   :  { %1503 = vmatpush.msra.mxu2 %v1387_v48  ;;  %1465 = vmatpush.msra.mxu0 %v1319_v49  ;;  %v1354_v22 = vld [vmem:[#allocation8 + $0x128] sm:$0xff]  ;;  %v1433_v49 = vld [vmem:[#allocation8 + $0x3a0] sm:$0xff] }
 0x1a7   :  { %1485 = vmatpush.msra.mxu1 %v1351_v51  ;;  %1513 = vmatpush.msra.mxu3 %v1439_v12  ;;  %v1388_v51 = vld [vmem:[#allocation8 + $0x238] sm:$0xff] }
 0x1a8   :  { %1504 = vmatpush.msra.mxu2 %v1385_v52  ;;  %1466 = vmatpush.msra.mxu0 %v1317_v54  ;;  %v1352_v52 = vld [vmem:[#allocation8 + $0x118] sm:$0xff]  ;;  %v1431_v54 = vld [vmem:[#allocation8 + $0x390] sm:$0xff] }
 0x1a9   :  { %1486 = vmatpush.msra.mxu1 %v1349_v55  ;;  %1467 = vmatmul.f32.vlgmr.msra.gmra.mxu0 %v2054_v58  ;;  %v1318_v55 = vld [vmem:[#allocation8 + $0x8] sm:$0xff]  ;;  %v1416_v12 = vld [vmem:[#allocation8 + $0x318] sm:$0xff] }
 0x1aa   :  { %1487 = vmatmul.f32.vlgmr.msra.gmra.mxu1 %v2057_v63  ;;  %1531 = vmatpush.msrb.mxu0 %v1348_v57 }
 0x1ab   :  { %1551 = vmatpush.msrb.mxu1 %v1380_v59  ;;  %1505 = vmatpush.msra.mxu2 %v1383_v60  ;;  %v1386_v59 = vld [vmem:[#allocation8 + $0x228] sm:$0xff] }
 0x1ac   :  { %1532 = vmatpush.msrb.mxu0 %v1346_v3  ;;  %1514 = vmatpush.msra.mxu3 %v1437_v13  ;;  %v1350_v60 = vld [vmem:[#allocation8 + $0x108] sm:$0xff] }
 0x1ad   :  { %1552 = vmatpush.msrb.mxu1 %v1378_v61  ;;  %1506 = vmatpush.msra.mxu2 %v1381_v0  ;;  %v1384_v61 = vld [vmem:[#allocation8 + $0x218] sm:$0xff] }
 0x1ae   :  { %1533 = vmatpush.msrb.mxu0 %v1344_v1  ;;  %1515 = vmatpush.msra.mxu3 %v1435_v41 }
 0x1af   :  { %1571 = vmatpush.msrb.mxu2 %v1412_v2  ;;  %1553 = vmatpush.msrb.mxu1 %v1376_v4  ;;  %v1429_v2 = vld [vmem:[#allocation8 + $0x380] sm:$0xff]  ;;  %v1382_v4 = vld [vmem:[#allocation8 + $0x208] sm:$0xff] }
 0x1b0   :  { %1534 = vmatpush.msrb.mxu0 %v1342_v5  ;;  %1516 = vmatpush.msra.mxu3 %v1433_v49 }
 0x1b1   :  { %1572 = vmatpush.msrb.mxu2 %v1410_v39  ;;  %1554 = vmatpush.msrb.mxu1 %v1374_v6  ;;  %v1295_v39 = vperm.slane %v2049_v56, 2  ;;  %v1427_v6 = vld [vmem:[#allocation8 + $0x370] sm:$0xff] }
 0x1b2   :  { %1535 = vmatpush.msrb.mxu0 %v1340_v7  ;;  %1517 = vmatpush.msra.mxu3 %v1431_v54  ;;  %v1855_v54 = vmov 0  }
 0x1b3   :  { %1573 = vmatpush.msrb.mxu2 %v1408_v34  ;;  %1555 = vmatpush.msrb.mxu1 %v1372_v9  ;;  %v1425_v9 = vld [vmem:[#allocation8 + $0x360] sm:$0xff] }
 0x1b4   :  { %1536 = vmatpush.msrb.mxu0 %v1338_v10  ;;  %1518 = vmatpush.msra.mxu3 %v1429_v2 }
 0x1b5   :  { %1574 = vmatpush.msrb.mxu2 %v1406_v11  ;;  %1556 = vmatpush.msrb.mxu1 %v1370_v14  ;;  %v1423_v11 = vld [vmem:[#allocation8 + $0x350] sm:$0xff] }
 0x1b6   :  { %1537 = vmatpush.msrb.mxu0 %v1336_v16  ;;  %v997_v18 = vpop.f32.mrf.mxu2  ;;  %v1017_v23 = vpop.f32.mrf.mxu3  ;;  %1519 = vmatpush.msra.mxu3 %v1427_v6 }
 0x1b7   :  { %1575 = vmatpush.msrb.mxu2 %v1404_v19  ;;  %1557 = vmatpush.msrb.mxu1 %v1368_v20  ;;  %v998_v45 = vadd.f32 %v997_v18, %v978_v17  ;;  %v1417_v19 = vld [vmem:[#allocation8 + $0x320] sm:$0xff]  ;;  %v1415_v20 = vld [vmem:[#allocation8 + $0x310] sm:$0xff] }
 0x1b8   :  { %1538 = vmatpush.msrb.mxu0 %v1334_v24  ;;  %1520 = vmatpush.msra.mxu3 %v1425_v9  ;;  %v1444_v24 = vld [vmem:[#allocation8 + $0x3f8] sm:$0xff] }
 0x1b9   :  { %1576 = vmatpush.msrb.mxu2 %v1402_v25  ;;  %1558 = vmatpush.msrb.mxu1 %v1366_v26  ;;  %v1018_v48 = vadd.f32 %v1017_v23, %v998_v45  ;;  %v1442_v25 = vld [vmem:[#allocation8 + $0x3e8] sm:$0xff]  ;;  %v1440_v26 = vld [vmem:[#allocation8 + $0x3d8] sm:$0xff] }
 0x1ba   :  { %1539 = vmatpush.msrb.mxu0 %v1332_v27  ;;  %v1037_v53 = vpop.f32.mrf.mxu0  ;;  %1521 = vmatpush.msra.mxu3 %v1423_v11  ;;  %v1438_v27 = vld [vmem:[#allocation8 + $0x3c8] sm:$0xff] }
 0x1bb   :  { %1577 = vmatpush.msrb.mxu2 %v1400_v28  ;;  %1559 = vmatpush.msrb.mxu1 %v1364_v29  ;;  %v1038_v57 = vadd.f32 %v1037_v53, %v1018_v48  ;;  %v1436_v28 = vld [vmem:[#allocation8 + $0x3b8] sm:$0xff]  ;;  %v1434_v29 = vld [vmem:[#allocation8 + $0x3a8] sm:$0xff]  ;;  %v1445_v53 = vld [vmem:[#allocation9] sm:$0x3] }
 0x1bc   :  { %1540 = vmatpush.msrb.mxu0 %v1330_v30  ;;  %v1432_v30 = vld [vmem:[#allocation8 + $0x398] sm:$0xff]  ;;  %1707 = vset.pattern.permute.xlu0 %v1855_v54 }
 0x1bd   :  { %1578 = vmatpush.msrb.mxu2 %v1398_v62  ;;  %1560 = vmatpush.msrb.mxu1 %v1362_v31  ;;  %v1430_v62 = vld [vmem:[#allocation8 + $0x388] sm:$0xff]  ;;  %v1428_v31 = vld [vmem:[#allocation8 + $0x378] sm:$0xff] }
 0x1be   :  { %1541 = vmatpush.msrb.mxu0 %v1328_v35  ;;  %v1424_v35 = vld [vmem:[#allocation8 + $0x358] sm:$0xff] }
 0x1bf   :  { %1579 = vmatpush.msrb.mxu2 %v1396_v36  ;;  %1561 = vmatpush.msrb.mxu1 %v1360_v38  ;;  %v1422_v36 = vld [vmem:[#allocation8 + $0x348] sm:$0xff] }
 0x1c0   :  { %1542 = vmatpush.msrb.mxu0 %v1326_v8  ;;  %v1418_v38 = vld [vmem:[#allocation8 + $0x328] sm:$0xff] }
 0x1c1   :  { %1580 = vmatpush.msrb.mxu2 %v1394_v40  ;;  %1562 = vmatpush.msrb.mxu1 %v1358_v42  ;;  %v1057_v3 = vpop.f32.mrf.mxu1 }
 0x1c2   :  { %1543 = vmatpush.msrb.mxu0 %v1324_v43  ;;  %v1058_v0 = vadd.f32 %v1057_v3, %v1038_v57 }
 0x1c3   :  { %1581 = vmatpush.msrb.mxu2 %v1392_v15  ;;  %1563 = vmatpush.msrb.mxu1 %v1356_v44 }
 0x1c4   :  { %1544 = vmatpush.msrb.mxu0 %v1322_v46  ;;  %v1077_v1 = vpop.f32.mrf.mxu2 }
 0x1c5   :  { %1582 = vmatpush.msrb.mxu2 %v1390_v47  ;;  %1564 = vmatpush.msrb.mxu1 %v1354_v22  ;;  %v1078_v5 = vadd.f32 %v1077_v1, %v1058_v0  ;;  %v1097_v7 = vpop.f32.mrf.mxu3  ;;  %v1296_v47 = vperm.slane %v2049_v56, 3  ;;  %v1448_v56 = vperm.slane %v1445_v53, 1 }
 0x1c6   :  { %1545 = vmatpush.msrb.mxu0 %v1320_v50 }
 0x1c7   :  { %1583 = vmatpush.msrb.mxu2 %v1388_v51  ;;  %1565 = vmatpush.msrb.mxu1 %v1352_v52  ;;  %v1098_v34 = vadd.f32 %v1097_v7, %v1078_v5  ;;  %v1618_v52 = vld [vmem:[#allocation3] sm:$0x1] }
 0x1c8   :  { %1546 = vmatpush.msrb.mxu0 %v1318_v55  ;;  %1621 = vperm.xlu0 %1707, %v1618_v52   ;;  %v1447_v55 = vperm.slane %v1445_v53, 0 }
 0x1c9   :  { %1584 = vmatpush.msrb.mxu2 %v1386_v59  ;;  %1566 = vmatpush.msrb.mxu1 %v1350_v60  ;;  %v1303_v10 = vadd.f32 %v1295_v39, %v1098_v34  ;;  %v1617_v39 = vld [vmem:[#allocation11] sm:$0x3] }
 0x1ca   :  { %1547 = vmatmul.f32.vlgmr.msrb.gmra.mxu0 %v2054_v58  ;;  %1567 = vmatmul.f32.vlgmr.msrb.gmra.mxu1 %v2057_v63  ;;  %v1421_v58 = vld [vmem:[#allocation8 + $0x340] sm:$0xff]  ;;  %v1419_v63 = vld [vmem:[#allocation8 + $0x330] sm:$0xff]  ;;  %v1626_v11 = vperm.slane %v1617_v39, 0 }
 0x1cb   :  { %1585 = vmatpush.msrb.mxu2 %v1384_v61  ;;  %v1311_v14 = vmul.f32 0.2, %v1303_v10  ;;  %vm1307_vm2 = vcmp.gt.f32.partialorder %v1303_v10, 0.0  ;;  %1522 = vmatpush.msra.mxu3 %v1421_v58 }
 0x1cd   :  { %1586 = vmatpush.msrb.mxu2 %v1382_v4  ;;  %v1315_v16 = vsel %vm1307_vm2, %v1303_v10, %v1311_v14  ;;  %1523 = vmatpush.msra.mxu3 %v1419_v63 }
 0x1ce   :  { %1507 = vmatmul.f32.vlgmr.msra.gmra.mxu2 %v1315_v16 }
 0x1cf   :  { %1524 = vmatpush.msra.mxu3 %v1417_v19 }
 0x1d1   :  { %1525 = vmatpush.msra.mxu3 %v1415_v20  ;;  %v1627_v20 = vperm.slane %v1617_v39, 1 }
 0x1d3   :  { %1526 = vmatpush.msra.mxu3 %v1413_v21 }
 0x1d5   :  { %1591 = vmatpush.msrb.mxu3 %v1444_v24 }
 0x1d6   :  { %1587 = vmatmul.f32.vlgmr.msrb.gmra.mxu2 %v1315_v16 }
 0x1d7   :  { %1592 = vmatpush.msrb.mxu3 %v1442_v25 }
 0x1d9   :  { %1593 = vmatpush.msrb.mxu3 %v1440_v26 }
 0x1db   :  { %1594 = vmatpush.msrb.mxu3 %v1438_v27 }
 0x1dd   :  { %1595 = vmatpush.msrb.mxu3 %v1436_v28 }
 0x1df   :  { %1596 = vmatpush.msrb.mxu3 %v1434_v29 }
 0x1e1   :  { %1597 = vmatpush.msrb.mxu3 %v1432_v30 }
 0x1e3   :  { %1598 = vmatpush.msrb.mxu3 %v1430_v62 }
 0x1e5   :  { %1599 = vmatpush.msrb.mxu3 %v1428_v31 }
 0x1e7   :  { %1600 = vmatpush.msrb.mxu3 %v1426_v32 }
 0x1e9   :  { %1601 = vmatpush.msrb.mxu3 %v1424_v35 }
 0x1eb   :  { %1602 = vmatpush.msrb.mxu3 %v1422_v36 }
 0x1ed   :  { %1603 = vmatpush.msrb.mxu3 %v1420_v37 }
 0x1ef   :  { %1604 = vmatpush.msrb.mxu3 %v1418_v38 }
 0x1f1   :  { %1605 = vmatpush.msrb.mxu3 %v1416_v12 }
 0x1f3   :  { %1606 = vmatpush.msrb.mxu3 %v1414_v33 }
 0x1f5   :  { %v1117_v8 = vpop.f32.mrf.mxu0 }
 0x1f6   :  { %v1137_v40 = vpop.f32.mrf.mxu1 }
 0x1f7   :  { %v1138_v42 = vadd.f32 %v1137_v40, %v1117_v8 }
 0x1f9   :  { %v1157_v17 = vpop.f32.mrf.mxu2 }
 0x1fa   :  { %v1158_v18 = vadd.f32 %v1157_v17, %v1138_v42 }
 0x1fd   :  { %v1177_v13 = vpop.f32.mrf.mxu3 }
 0x1fe   :  { %v1178_v43 = vadd.f32 %v1177_v13, %v1158_v18 }
 0x204   :  { %v1197_v15 = vpop.f32.mrf.mxu0 }
 0x205   :  { %v1198_v44 = vadd.f32 %v1197_v15, %v1178_v43  ;;  %v1217_v45 = vpop.f32.mrf.mxu1 }
 0x207   :  { %v1218_v41 = vadd.f32 %v1217_v45, %v1198_v44 }
 0x20c   :  { %v1237_v46 = vpop.f32.mrf.mxu2 }
 0x20d   :  { %v1238_v23 = vadd.f32 %v1237_v46, %v1218_v41 }
 0x210   :  { %v1257_v22 = vpop.f32.mrf.mxu3 }
 0x211   :  { %v1258_v48 = vadd.f32 %v1257_v22, %v1238_v23 }
 0x213   :  { %v1304_v49 = vadd.f32 %v1296_v47, %v1258_v48 }
 0x215   :  { %v1312_v50 = vmul.f32 0.2, %v1304_v49  ;;  %vm1308_vm3 = vcmp.gt.f32.partialorder %v1304_v49, 0.0 }
 0x217   :  { %v1316_v51 = vsel %vm1308_vm3, %v1304_v49, %v1312_v50 }
 0x218   :  { %1527 = vmatmul.f32.vlgmr.msra.gmra.mxu3 %v1316_v51 }
 0x220   :  { %1607 = vmatmul.f32.vlgmr.msrb.gmra.mxu3 %v1316_v51 }
 0x226   :  { %v1468_v57 = vpop.f32.mrf.mxu0 }
 0x227   :  { %v1469_v59 = vadd.f32 %v1468_v57, %v1447_v55  ;;  %v1488_v3 = vpop.f32.mrf.mxu1 }
 0x229   :  { %v1489_v61 = vadd.f32 %v1488_v3, %v1469_v59 }
 0x23a   :  { %v1622_v21 = vpop.permute.xlu0 %1621 }
 0x23b   :  { %v1624_v24 = vperm.slane %v1622_v21, 0 }
 0x247   :  { %v1548_v0 = vpop.f32.mrf.mxu0  ;;  %v1568_v7 = vpop.f32.mrf.mxu1 }
 0x248   :  { %v1549_v4 = vadd.f32 %v1548_v0, %v1448_v56 }
 0x24a   :  { %v1569_v9 = vadd.f32 %v1568_v7, %v1549_v4 }
 0x251   :  { %v1508_v60 = vpop.f32.mrf.mxu2 }
 0x252   :  { %v1509_v1 = vadd.f32 %v1508_v60, %v1489_v61 }
 0x259   :  { %v1588_v34 = vpop.f32.mrf.mxu2 }
 0x25a   :  { %v1589_v14 = vadd.f32 %v1588_v34, %v1569_v9 }
 0x29b   :  { %v1528_v2 = vpop.f32.mrf.mxu3 }
 0x29c   :  { %v1529_v5 = vadd.f32 %v1528_v2, %v1509_v1 }
 0x29e   :  { %vm1611_vm4 = vcmp.gt.f32.partialorder %v1529_v5, 0.0  ;;  %v1613_v6 = vmul.f32 0.2, %v1529_v5 }
 0x2a0   :  { %v1615_v10 = vsel %vm1611_vm4, %v1529_v5, %v1613_v6 }
 0x2a1   :  { %1645 = vmatpush.xpose.msra.mxu0 %v1615_v10 }
 0x2a3   :  { %v1608_v58 = vpop.f32.mrf.mxu3 }
 0x2a4   :  { %v1609_v16 = vadd.f32 %v1608_v58, %v1589_v14  ;;  %1646 = vmatmul.f32.vlgmr.msra.gmra.mxu0 %v1626_v11 }
 0x2a6   :  { %vm1612_vm5 = vcmp.gt.f32.partialorder %v1609_v16, 0.0  ;;  %v1614_v63 = vmul.f32 0.2, %v1609_v16 }
 0x2a8   :  { %v1616_v19 = vsel %vm1612_vm5, %v1609_v16, %v1614_v63 }
 0x2a9   :  { %1665 = vmatpush.xpose.msra.mxu1 %v1616_v19 }
 0x2ac   :  { %1666 = vmatmul.f32.vlgmr.msra.gmra.mxu1 %v1627_v20 }
 0x321   :  { %v1647_v25 = vpop.f32.mrf.mxu0 }
 0x322   :  { %v1648_v26 = vadd.f32 %v1647_v25, %v1624_v24 }
 0x329   :  { %v1667_v27 = vpop.f32.mrf.mxu1 }
 0x32a   :  { %v1668_v28 = vadd.f32 %v1667_v27, %v1648_v26 }
 0x32c   :  { %v1670_v29 = vsub.f32 0.0, %v1668_v28 }
 0x32e   :  { %v1671_v30 = vmul.f32 1.442695, %v1670_v29 }
 0x330   :  { %1708 = vpow2.f32 %v1671_v30 }
 0x336   :  { %v1709_v62 = vpop.eup %1708 }
 0x337   :  { %v1673_v31 = vadd.f32 1.0, %v1709_v62 }
 0x339   :  { %1710 = vrcp.f32 %v1673_v31  ;;  %v1685_v37 = vand.u32 2147483648, %v1673_v31  ;;  %v1683_v12 = vand.u32 2147483647, %v1673_v31  ;;  %vm1679_vm7 = vweird.f32 %v1673_v31 }
 0x33b   :  { %v1686_v33 = vor.u32 1.1754944e-38, %v1685_v37  ;;  %vm1684_vm10 = vcmp.eq.f32.partialorder %v1683_v12, 8.507059e+37 }
 0x33f   :  { %v1711_v32 = vpop.eup %1710 }
 0x340   :  { %v1675_v35 = vmul.f32 %v1711_v32, %v1673_v31  ;;  %vm1680_vm6 = vweird.f32 %v1711_v32 }
 0x341   :  { %vm1681_vm8 = vmor %vm1679_vm7, %vm1680_vm6 }
 0x342   :  { %v1676_v36 = vsub.f32 1.0, %v1675_v35 }
 0x344   :  { %v1677_v38 = vmul.f32 %v1711_v32, %v1676_v36 }
 0x346   :  { %v1678_v8 = vadd.f32 %v1711_v32, %v1677_v38 }
 0x348   :  { %v1682_v40 = vsel %vm1681_vm8, %v1711_v32, %v1678_v8 }
 0x349   :  { %v1687_v42 = vsel %vm1684_vm10, %v1686_v33, %v1682_v40 }
 0x34a   :  { %1689 = vst.msk [vmem:[%s2074_s7] sm:$0x1] %vm1688_vm9, %v1687_v42 }
 0x34b   :  { %1694 = vsyncpa [#allocation5], 1 }
 0x34c   :  { %1695 = vsyncpa [#allocation7], 1 }
 0x34d   :  { %1696 = vsyncpa [#allocation10], 1 }

</bundles_post_ra>
